<compile_context>
chip_gen: v7x
topology: tpu7x:2x2x1
jax: 0.10.0
libtpu: 0.0.40
codegen_flags: <defaults>
</compile_context>

<pallas_src>
import functools

import jax
import jax.numpy as jnp
from jax.experimental import pallas as pl
from jax.experimental.pallas import tpu as pltpu

EPS = 1e-5


def _fold_bn(gamma, beta, mean, var):
    scale = gamma / jnp.sqrt(var + EPS)
    bias = beta - mean * scale
    return scale.astype(jnp.float32), bias.astype(jnp.float32)


# ----------------- fused kernel: whole bottleneck for B images -----------------
def _bottleneck_kernel(x_ref, bn_ref, mask_ref, w1_ref, w2_ref, w3_ref, o_ref,
                       *, W, cin, c1, c2, compute_dtype):
    cdt = compute_dtype
    L = x_ref.shape[1]                                  # B * H * W lanes

    x = x_ref[...].astype(jnp.float32)                  # (cin, L)

    # packed BN params: columns are [s1, b1, s2, b2, s3, b3, 0, 0]
    bn = bn_ref[...]                                    # (Cpad, 8) f32
    s1, b1 = bn[:cin, 0:1], bn[:cin, 1:2]
    s2, b2 = bn[:c1, 2:3], bn[:c1, 3:4]
    s3, b3 = bn[:c2, 4:5], bn[:c2, 5:6]

    masks = mask_ref[...]                               # (8, L) f32, 0/1

    # bn1 (channel_selection folded) + relu, conv1 (1x1)
    y = jnp.maximum(x * s1 + b1, 0.0)
    z = jnp.dot(w1_ref[...], y.astype(cdt),
                preferred_element_type=jnp.float32)     # (c1, L)
    # bn2 + relu
    z = jnp.maximum(z * s2 + b2, 0.0)

    # conv2 (3x3, pad=1, stride=1) as im2col on the flattened lane axis.
    # Rolls stay in f32 (portable on all TPU gens); columns are cast to the
    # compute dtype so `patches` is bf16 when bf16 matmuls are enabled.
    cols = []
    m = 0
    for dy in (-1, 0, 1):
        for dx in (-1, 0, 1):
            if dy == 0 and dx == 0:
                cols.append(z.astype(cdt))              # center tap
            else:
                off = dy * W + dx
                shifted = pltpu.roll(z, shift=(-off) % L, axis=1)   # XLU rotate
                cols.append((shifted * masks[m:m + 1, :]).astype(cdt))
                m += 1
    patches = jnp.concatenate(cols, axis=0)             # (9*c1, L)

    # single conv2 matmul: (c2, 9*c1) @ (9*c1, L)
    conv = jnp.dot(w2_ref[...], patches, preferred_element_type=jnp.float32)
    # bn3 + relu
    a = jnp.maximum(conv * s3 + b3, 0.0)                # (c2, L) f32
    # conv3 (1x1) + identity residual
    out = jnp.dot(w3_ref[...], a.astype(cdt), preferred_element_type=jnp.float32)
    o_ref[...] = (out + x).astype(o_ref.dtype)


def _build_tap_masks(H, W, B):
    """0/1 validity masks for the 8 non-center taps, tiled over the batch block."""
    HW = H * W
    hh = jnp.arange(HW, dtype=jnp.int32) // W
    ww = jnp.arange(HW, dtype=jnp.int32) % W
    rows = []
    for dy in (-1, 0, 1):
        for dx in (-1, 0, 1):
            if dy == 0 and dx == 0:
                continue
            valid = ((hh + dy >= 0) & (hh + dy < H)
                     & (ww + dx >= 0) & (ww + dx < W))
            rows.append(valid)
    m = jnp.stack(rows).astype(jnp.float32)             # (8, HW)
    return jnp.tile(m, (1, B))                          # (8, B*HW)


def _pick_batch_block(N, HW, cin, c1, c2, cout, compute_dtype,
                      vmem_budget_bytes=24 << 20):
    """Largest B that divides N, keeps >=2 grid steps (v7x has 2 TensorCores),
    keeps the lane block a multiple of 128, and fits a conservative VMEM budget
    (sized for v7x's 64 MiB VMEM / 32 MiB default scoped limit)."""
    cbytes = jnp.dtype(compute_dtype).itemsize

    def block_bytes(b):
        lanes = b * HW
        io = 2 * (cin + cout) * lanes * 4            # double-buffered in/out blocks
        inter = (cin + c1 + c2 + cout) * lanes * 4   # f32 intermediates
        inter += (c1 + 9 * c1 + c2) * lanes * cbytes  # compute-dtype operands
        fixed = 8 * lanes * 4                        # tap masks
        return io + inter + fixed

    best = 1
    for b in range(1, N + 1):
        if N % b:
            continue
        if N >= 2 and N // b < 2:        # keep both v7x TCs busy
            continue
        if (b * HW) % 128 != 0 and b != N:
            continue
        if block_bytes(b) <= vmem_budget_bytes:
            best = max(best, b)
    return best


def bottleneck_forward(x_nchw, params, *, compute_dtype=jnp.float32,
                       batch_block=None):
    N, cin, H, W = x_nchw.shape
    HW = H * W

    s1, b1 = params["bn1"]
    s2, b2 = params["bn2"]
    s3, b3 = params["bn3"]
    sel = params["select"]
    w1 = params["w1"]          # (cin, c1)
    w2 = params["w2"]          # (9, c1, c2)  taps row-major over (dy, dx)
    w3 = params["w3"]          # (c2, cout)
    c1, c2, cout = w1.shape[1], w2.shape[2], w3.shape[1]
    assert cout == cin, "identity residual requires planes*4 == inplanes"

    B = batch_block if batch_block is not None else _pick_batch_block(
        N, HW, cin, c1, c2, cout, compute_dtype)
    assert N % B == 0
    L = B * HW
    grid = (N // B,)

    # channels-on-sublanes / batch*spatial-on-lanes; no host-side upcast.
    x = x_nchw.reshape(N, cin, HW).transpose(1, 0, 2).reshape(cin, N * HW)

    # Pack the six BN scale/bias vectors into one (Cpad, 8) block (one DMA).
    cmax = max(cin, c1, c2)
    cpad = ((cmax + 7) // 8) * 8
    bn_packed = jnp.zeros((cpad, 8), jnp.float32)
    bn_packed = bn_packed.at[:cin, 0].set(s1 * sel).at[:cin, 1].set(b1 * sel)
    bn_packed = bn_packed.at[:c1, 2].set(s2).at[:c1, 3].set(b2)
    bn_packed = bn_packed.at[:c2, 4].set(s3).at[:c2, 5].set(b3)

    masks = _build_tap_masks(H, W, B)                      # (8, L)

    # Weights pre-transposed so the kernel computes W^T @ X; cast to the
    # matmul operand dtype (bf16 on v6e/v7x, f32 otherwise).
    w1t = w1.T.astype(compute_dtype)                                   # (c1, cin)
    w2t = jnp.transpose(w2, (2, 0, 1)).reshape(c2, 9 * c1).astype(compute_dtype)
    w3t = w3.T.astype(compute_dtype)                                   # (cout, c2)

    out_dtype = x_nchw.dtype
    kernel = functools.partial(_bottleneck_kernel, W=W, cin=cin, c1=c1, c2=c2,
                               compute_dtype=compute_dtype)

    out = pl.pallas_call(
        kernel,
        out_shape=jax.ShapeDtypeStruct((cout, N * HW), out_dtype),
        grid=grid,
        in_specs=[
            pl.BlockSpec((cin, L), lambda n: (0, n)),       # activation block
            pl.BlockSpec((cpad, 8), lambda n: (0, 0)),      # packed BN params
            pl.BlockSpec((8, L), lambda n: (0, 0)),         # tap boundary masks
            pl.BlockSpec((c1, cin), lambda n: (0, 0)),      # w1^T
            pl.BlockSpec((c2, 9 * c1), lambda n: (0, 0)),   # w2^T (im2col K)
            pl.BlockSpec((cout, c2), lambda n: (0, 0)),     # w3^T
        ],
        out_specs=pl.BlockSpec((cout, L), lambda n: (0, n)),
        compiler_params=pltpu.CompilerParams(
            dimension_semantics=("parallel",)),
    )(x, bn_packed, masks, w1t, w2t, w3t)

    return out.reshape(cout, N, HW).transpose(1, 0, 2).reshape(N, cout, H, W)


# ------------------------------ glue / reference ------------------------------
def init_params(key, cin, c1, c2, cout):
    ks = jax.random.split(key, 16)

    def bn(k0, k1, k2, k3, c):
        gamma = jax.random.uniform(k0, (c,), jnp.float32, 0.5, 1.5)
        beta = jax.random.normal(k1, (c,), jnp.float32) * 0.1
        mean = jax.random.normal(k2, (c,), jnp.float32) * 0.1
        var = jax.random.uniform(k3, (c,), jnp.float32, 0.5, 1.5)
        return _fold_bn(gamma, beta, mean, var)

    return {
        "bn1": bn(ks[0], ks[1], ks[2], ks[3], cin),
        "bn2": bn(ks[4], ks[5], ks[6], ks[7], c1),
        "bn3": bn(ks[8], ks[9], ks[10], ks[11], c2),
        "select": jnp.ones((cin,), jnp.float32),   # channel_selection indexes
        "w1": jax.random.normal(ks[12], (cin, c1), jnp.float32) * (2.0 / cin) ** 0.5,
        "w2": jax.random.normal(ks[13], (9, c1, c2), jnp.float32) * (2.0 / (9 * c1)) ** 0.5,
        "w3": jax.random.normal(ks[14], (c2, cout), jnp.float32) * (2.0 / c2) ** 0.5,
    }


def ref_forward(x_nchw, params):
    x = jnp.transpose(x_nchw, (0, 2, 3, 1)).astype(jnp.float32)     # NHWC
    N, H, W, cin = x.shape
    s1, b1 = params["bn1"]; s2, b2 = params["bn2"]; s3, b3 = params["bn3"]
    w1, w2, w3 = params["w1"], params["w2"], params["w3"]
    y = jnp.maximum((x * s1 + b1) * params["select"], 0.0)
    z = jnp.maximum(jnp.einsum("nhwc,cd->nhwd", y, w1) * s2 + b2, 0.0)
    zp = jnp.pad(z, ((0, 0), (1, 1), (1, 1), (0, 0)))
    conv = jnp.zeros((N, H, W, w2.shape[2]), jnp.float32)
    for tap in range(9):
        dy, dx = tap // 3, tap % 3
        conv = conv + jnp.einsum("nhwc,cd->nhwd", zp[:, dy:dy + H, dx:dx + W, :], w2[tap])
    a = jnp.maximum(conv * s3 + b3, 0.0)
    out = jnp.einsum("nhwc,cd->nhwd", a, w3) + x
    return jnp.transpose(out, (0, 3, 1, 2))


if __name__ == "__main__":
    key = jax.random.PRNGKey(0)
    N, cin, H, W = 8, 16, 16, 16
    planes = 4                    # planes * expansion(4) == cin -> identity residual
    cfg = [cin, 8, 8]             # channel_selection keeps all -> cfg[0] == inplanes
    c1, c2, cout = cfg[1], cfg[2], planes * 4

    kx, kp = jax.random.split(key)
    x = jax.random.normal(kx, (N, cin, H, W), jnp.float32)
    params = init_params(kp, cin, c1, c2, cout)
    ref = ref_forward(x, params)

    # f32 path: exact parity with the f32 reference (tight tolerance).
    fwd_f32 = jax.jit(functools.partial(bottleneck_forward,
                                        compute_dtype=jnp.float32))
    out = jax.block_until_ready(fwd_f32(x, params))
    assert out.shape == (N, cout, H, W)
    assert jnp.allclose(out, ref, rtol=1e-4, atol=1e-4), "f32 mismatch vs reference"

    # bf16 MXU-operand path (v6e/v7x optimization): f32 accumulation, f32
    # elementwise math; checked with a looser tolerance vs the f32 reference.
    fwd_bf16 = jax.jit(functools.partial(bottleneck_forward,
                                         compute_dtype=jnp.bfloat16))
    out_bf16 = jax.block_until_ready(fwd_bf16(x, params))
    scale = float(jnp.max(jnp.abs(ref)))
    err = float(jnp.max(jnp.abs(out_bf16.astype(jnp.float32) - ref)))
    assert err <= 5e-2 * scale + 1e-3, "bf16 mismatch vs reference"

    print("KERNEL_OK")
</pallas_src>

<mosaic_0001>
module attributes {stable_mosaic.version = 11 : i64} {
  func.func @_bottleneck_kernel(%arg0: i32, %arg1: memref<16x1024xf32, #tpu.memory_space<vmem>>, %arg2: memref<16x8xf32, #tpu.memory_space<vmem>>, %arg3: memref<8x1024xf32, #tpu.memory_space<vmem>>, %arg4: memref<8x16xf32, #tpu.memory_space<vmem>>, %arg5: memref<8x72xf32, #tpu.memory_space<vmem>>, %arg6: memref<16x8xf32, #tpu.memory_space<vmem>>, %arg7: memref<16x1024xf32, #tpu.memory_space<vmem>>) attributes {dimension_semantics = [#tpu.dimension_semantics<parallel>], iteration_bounds = array<i64: 2>, scalar_prefetch = 0 : i64, scratch_operands = 0 : i64, tpu.core_type = #tpu.core_type<tc>, window_params = [{transform_indices = @transform_0, window_bounds = array<i64: 16, 1024>}, {pipeline_mode = #tpu.pipeline_mode<synchronous>, transform_indices = @transform_1, window_bounds = array<i64: 16, 8>}, {pipeline_mode = #tpu.pipeline_mode<synchronous>, transform_indices = @transform_2, window_bounds = array<i64: 8, 1024>}, {pipeline_mode = #tpu.pipeline_mode<synchronous>, transform_indices = @transform_3, window_bounds = array<i64: 8, 16>}, {pipeline_mode = #tpu.pipeline_mode<synchronous>, transform_indices = @transform_4, window_bounds = array<i64: 8, 72>}, {pipeline_mode = #tpu.pipeline_mode<synchronous>, transform_indices = @transform_5, window_bounds = array<i64: 16, 8>}, {transform_indices = @transform_6, window_bounds = array<i64: 16, 1024>}]} {
    %c0 = arith.constant 0 : index
    %c0_0 = arith.constant 0 : index
    %0 = vector.load %arg1[%c0, %c0_0] : memref<16x1024xf32, #tpu.memory_space<vmem>>, vector<16x1024xf32>
    %c0_1 = arith.constant 0 : index
    %c0_2 = arith.constant 0 : index
    %1 = vector.load %arg2[%c0_1, %c0_2] : memref<16x8xf32, #tpu.memory_space<vmem>>, vector<16x8xf32>
    %2 = vector.extract_strided_slice %1 {offsets = [0, 0], sizes = [16, 1], strides = [1, 1]} : vector<16x8xf32> to vector<16x1xf32>
    %3 = vector.extract_strided_slice %1 {offsets = [0, 1], sizes = [16, 1], strides = [1, 1]} : vector<16x8xf32> to vector<16x1xf32>
    %4 = vector.extract_strided_slice %1 {offsets = [0, 2], sizes = [8, 1], strides = [1, 1]} : vector<16x8xf32> to vector<8x1xf32>
    %5 = vector.extract_strided_slice %1 {offsets = [0, 3], sizes = [8, 1], strides = [1, 1]} : vector<16x8xf32> to vector<8x1xf32>
    %6 = vector.extract_strided_slice %1 {offsets = [0, 4], sizes = [8, 1], strides = [1, 1]} : vector<16x8xf32> to vector<8x1xf32>
    %7 = vector.extract_strided_slice %1 {offsets = [0, 5], sizes = [8, 1], strides = [1, 1]} : vector<16x8xf32> to vector<8x1xf32>
    %c0_3 = arith.constant 0 : index
    %c0_4 = arith.constant 0 : index
    %8 = vector.load %arg3[%c0_3, %c0_4] : memref<8x1024xf32, #tpu.memory_space<vmem>>, vector<8x1024xf32>
    %9 = vector.broadcast %2 : vector<16x1xf32> to vector<16x1024xf32>
    %10 = arith.mulf %0, %9 : vector<16x1024xf32>
    %11 = vector.broadcast %3 : vector<16x1xf32> to vector<16x1024xf32>
    %12 = arith.addf %10, %11 : vector<16x1024xf32>
    %cst = arith.constant 0.000000e+00 : f32
    %13 = vector.broadcast %cst : f32 to vector<16x1024xf32>
    %14 = arith.maximumf %12, %13 : vector<16x1024xf32>
    %c0_5 = arith.constant 0 : index
    %c0_6 = arith.constant 0 : index
    %15 = vector.load %arg4[%c0_5, %c0_6] : memref<8x16xf32, #tpu.memory_space<vmem>>, vector<8x16xf32>
    %cst_7 = arith.constant dense<0.000000e+00> : vector<8x1024xf32>
    %16 = tpu.matmul %15, %14, %cst_7 {dimension_numbers = #tpu.dot_dimension_numbers<[1], [0], [0], [1], [0, 0, 1, 1], [], []>} : vector<8x16xf32>, vector<16x1024xf32>, vector<8x1024xf32> -> vector<8x1024xf32>
    %17 = vector.broadcast %4 : vector<8x1xf32> to vector<8x1024xf32>
    %18 = arith.mulf %16, %17 : vector<8x1024xf32>
    %19 = vector.broadcast %5 : vector<8x1xf32> to vector<8x1024xf32>
    %20 = arith.addf %18, %19 : vector<8x1024xf32>
    %cst_8 = arith.constant 0.000000e+00 : f32
    %21 = vector.broadcast %cst_8 : f32 to vector<8x1024xf32>
    %22 = arith.maximumf %20, %21 : vector<8x1024xf32>
    %c17_i32 = arith.constant 17 : i32
    %23 = tpu.dynamic_rotate %22 by %c17_i32 dim 1 : vector<8x1024xf32>, i32 -> vector<8x1024xf32>
    %24 = vector.extract_strided_slice %8 {offsets = [0, 0], sizes = [1, 1024], strides = [1, 1]} : vector<8x1024xf32> to vector<1x1024xf32>
    %25 = vector.broadcast %24 : vector<1x1024xf32> to vector<8x1024xf32>
    %26 = arith.mulf %23, %25 : vector<8x1024xf32>
    %c16_i32 = arith.constant 16 : i32
    %27 = tpu.dynamic_rotate %22 by %c16_i32 dim 1 : vector<8x1024xf32>, i32 -> vector<8x1024xf32>
    %28 = vector.extract_strided_slice %8 {offsets = [1, 0], sizes = [1, 1024], strides = [1, 1]} : vector<8x1024xf32> to vector<1x1024xf32>
    %29 = vector.broadcast %28 : vector<1x1024xf32> to vector<8x1024xf32>
    %30 = arith.mulf %27, %29 : vector<8x1024xf32>
    %c15_i32 = arith.constant 15 : i32
    %31 = tpu.dynamic_rotate %22 by %c15_i32 dim 1 : vector<8x1024xf32>, i32 -> vector<8x1024xf32>
    %32 = vector.extract_strided_slice %8 {offsets = [2, 0], sizes = [1, 1024], strides = [1, 1]} : vector<8x1024xf32> to vector<1x1024xf32>
    %33 = vector.broadcast %32 : vector<1x1024xf32> to vector<8x1024xf32>
    %34 = arith.mulf %31, %33 : vector<8x1024xf32>
    %c1_i32 = arith.constant 1 : i32
    %35 = tpu.dynamic_rotate %22 by %c1_i32 dim 1 : vector<8x1024xf32>, i32 -> vector<8x1024xf32>
    %36 = vector.extract_strided_slice %8 {offsets = [3, 0], sizes = [1, 1024], strides = [1, 1]} : vector<8x1024xf32> to vector<1x1024xf32>
    %37 = vector.broadcast %36 : vector<1x1024xf32> to vector<8x1024xf32>
    %38 = arith.mulf %35, %37 : vector<8x1024xf32>
    %c1023_i32 = arith.constant 1023 : i32
    %39 = tpu.dynamic_rotate %22 by %c1023_i32 dim 1 : vector<8x1024xf32>, i32 -> vector<8x1024xf32>
    %40 = vector.extract_strided_slice %8 {offsets = [4, 0], sizes = [1, 1024], strides = [1, 1]} : vector<8x1024xf32> to vector<1x1024xf32>
    %41 = vector.broadcast %40 : vector<1x1024xf32> to vector<8x1024xf32>
    %42 = arith.mulf %39, %41 : vector<8x1024xf32>
    %c1009_i32 = arith.constant 1009 : i32
    %43 = tpu.dynamic_rotate %22 by %c1009_i32 dim 1 : vector<8x1024xf32>, i32 -> vector<8x1024xf32>
    %44 = vector.extract_strided_slice %8 {offsets = [5, 0], sizes = [1, 1024], strides = [1, 1]} : vector<8x1024xf32> to vector<1x1024xf32>
    %45 = vector.broadcast %44 : vector<1x1024xf32> to vector<8x1024xf32>
    %46 = arith.mulf %43, %45 : vector<8x1024xf32>
    %c1008_i32 = arith.constant 1008 : i32
    %47 = tpu.dynamic_rotate %22 by %c1008_i32 dim 1 : vector<8x1024xf32>, i32 -> vector<8x1024xf32>
    %48 = vector.extract_strided_slice %8 {offsets = [6, 0], sizes = [1, 1024], strides = [1, 1]} : vector<8x1024xf32> to vector<1x1024xf32>
    %49 = vector.broadcast %48 : vector<1x1024xf32> to vector<8x1024xf32>
    %50 = arith.mulf %47, %49 : vector<8x1024xf32>
    %c1007_i32 = arith.constant 1007 : i32
    %51 = tpu.dynamic_rotate %22 by %c1007_i32 dim 1 : vector<8x1024xf32>, i32 -> vector<8x1024xf32>
    %52 = vector.extract_strided_slice %8 {offsets = [7, 0], sizes = [1, 1024], strides = [1, 1]} : vector<8x1024xf32> to vector<1x1024xf32>
    %53 = vector.broadcast %52 : vector<1x1024xf32> to vector<8x1024xf32>
    %54 = arith.mulf %51, %53 : vector<8x1024xf32>
    %55 = tpu.concatenate %26, %30, %34, %38, %22, %42, %46, %50, %54 in 0 : vector<8x1024xf32>, vector<8x1024xf32>, vector<8x1024xf32>, vector<8x1024xf32>, vector<8x1024xf32>, vector<8x1024xf32>, vector<8x1024xf32>, vector<8x1024xf32>, vector<8x1024xf32> -> vector<72x1024xf32>
    %c0_9 = arith.constant 0 : index
    %c0_10 = arith.constant 0 : index
    %56 = vector.load %arg5[%c0_9, %c0_10] : memref<8x72xf32, #tpu.memory_space<vmem>>, vector<8x72xf32>
    %cst_11 = arith.constant dense<0.000000e+00> : vector<8x1024xf32>
    %57 = tpu.matmul %56, %55, %cst_11 {dimension_numbers = #tpu.dot_dimension_numbers<[1], [0], [0], [1], [0, 0, 1, 1], [], []>} : vector<8x72xf32>, vector<72x1024xf32>, vector<8x1024xf32> -> vector<8x1024xf32>
    %58 = vector.broadcast %6 : vector<8x1xf32> to vector<8x1024xf32>
    %59 = arith.mulf %57, %58 : vector<8x1024xf32>
    %60 = vector.broadcast %7 : vector<8x1xf32> to vector<8x1024xf32>
    %61 = arith.addf %59, %60 : vector<8x1024xf32>
    %cst_12 = arith.constant 0.000000e+00 : f32
    %62 = vector.broadcast %cst_12 : f32 to vector<8x1024xf32>
    %63 = arith.maximumf %61, %62 : vector<8x1024xf32>
    %c0_13 = arith.constant 0 : index
    %c0_14 = arith.constant 0 : index
    %64 = vector.load %arg6[%c0_13, %c0_14] : memref<16x8xf32, #tpu.memory_space<vmem>>, vector<16x8xf32>
    %cst_15 = arith.constant dense<0.000000e+00> : vector<16x1024xf32>
    %65 = tpu.matmul %64, %63, %cst_15 {dimension_numbers = #tpu.dot_dimension_numbers<[1], [0], [0], [1], [0, 0, 1, 1], [], []>} : vector<16x8xf32>, vector<8x1024xf32>, vector<16x1024xf32> -> vector<16x1024xf32>
    %66 = arith.addf %65, %0 : vector<16x1024xf32>
    %c0_16 = arith.constant 0 : index
    %c0_17 = arith.constant 0 : index
    %67 = vector.load %arg7[%c0_16, %c0_17] : memref<16x1024xf32, #tpu.memory_space<vmem>>, vector<16x1024xf32>
    tpu.vector_store %arg7[%c0_16, %c0_17], %66 {strides = array<i32>} : memref<16x1024xf32, #tpu.memory_space<vmem>>, vector<16x1024xf32>,
    return
  }
  func.func @transform_0(%arg0: i32) -> (i32, i32) {
    %c0_i32 = arith.constant 0 : i32
    %c0_i32_0 = arith.constant 0 : i32
    return %c0_i32, %arg0 : i32, i32
  }
  func.func @transform_1(%arg0: i32) -> (i32, i32) {
    %c0_i32 = arith.constant 0 : i32
    %c0_i32_0 = arith.constant 0 : i32
    %c0_i32_1 = arith.constant 0 : i32
    return %c0_i32, %c0_i32_0 : i32, i32
  }
  func.func @transform_2(%arg0: i32) -> (i32, i32) {
    %c0_i32 = arith.constant 0 : i32
    %c0_i32_0 = arith.constant 0 : i32
    %c0_i32_1 = arith.constant 0 : i32
    return %c0_i32, %c0_i32_0 : i32, i32
  }
  func.func @transform_3(%arg0: i32) -> (i32, i32) {
    %c0_i32 = arith.constant 0 : i32
    %c0_i32_0 = arith.constant 0 : i32
    %c0_i32_1 = arith.constant 0 : i32
    return %c0_i32, %c0_i32_0 : i32, i32
  }
  func.func @transform_4(%arg0: i32) -> (i32, i32) {
    %c0_i32 = arith.constant 0 : i32
    %c0_i32_0 = arith.constant 0 : i32
    %c0_i32_1 = arith.constant 0 : i32
    return %c0_i32, %c0_i32_0 : i32, i32
  }
  func.func @transform_5(%arg0: i32) -> (i32, i32) {
    %c0_i32 = arith.constant 0 : i32
    %c0_i32_0 = arith.constant 0 : i32
    %c0_i32_1 = arith.constant 0 : i32
    return %c0_i32, %c0_i32_0 : i32, i32
  }
  func.func @transform_6(%arg0: i32) -> (i32, i32) {
    %c0_i32 = arith.constant 0 : i32
    %c0_i32_0 = arith.constant 0 : i32
    return %c0_i32, %arg0 : i32, i32
  }
}

</mosaic_0001>

<bundles_post_ra>
// kernel: bottleneck_forward.1
= control target key start
LH: loop header
LB: loop body
LE: loop exit
PB: predicated region body
PF: predicated region fallthrough
CT: control target
= control target key end

     0   :  { %s2248_s21 = smov 0   ;;  %s2250_s22 = smov 0   ;;  %s3138_s0 = inlined_call_operand.vmem [shape: f32[16,2048], index: 0, kind: input, shape index: {}]   ;;  %s3139_s1 = inlined_call_operand.vmem [shape: f32[16,8], index: 1, kind: input, shape index: {}]   ;;  %s3140_s2 = inlined_call_operand.vmem [shape: f32[8,1024], index: 2, kind: input, shape index: {}]   ;;  %s3141_s3 = inlined_call_operand.vmem [shape: f32[8,16], index: 3, kind: input, shape index: {}]   ;;  %s3142_s4 = inlined_call_operand.vmem [shape: f32[8,72], index: 4, kind: input, shape index: {}]   ;;  %s3143_s5 = inlined_call_operand.vmem [shape: f32[16,8], index: 5, kind: input, shape index: {}]   ;;  %s3144_s6 = inlined_call_operand.vmem [shape: f32[16,2048], index: 6, kind: output, shape index: {}]  }
   0x1   :  { %s2252_s23 = smov 0  }
   0x2 LB: > { %s2000_s24 = sadd.s32 4294967295, %s2196_s23   ;;  %s2265_s25 = sadd.s32 1, %s2196_s23   ;;  %s2196_s23 = sphi %s2252_s23, %s3191_s23   ;;  %s2192_s22 = sphi %s2250_s22, %s3190_s22   ;;  %s2188_s21 = sphi %s2248_s21, %s3189_s21  }
   0x3   : > { %s20_s26 = ssub.s32 %s2196_s23, %s2265_s25  ;;  %s23_s27 = sadd.s32 1, %s2192_s22 }
   0x4   : > { %p21_p0 = scmp.eq.s32.totalorder %s20_s26, 0  ;;  %p30_p1 = scmp.ne.s32.totalorder %s2192_s22, %s2188_s21 }
   0x5   : > { %p31_p2 = scmp.eq.s32.totalorder %s2196_s23, 0  ;;  %p165_p3 = scmp.eq.s32.totalorder %s2000_s24, 1 }
   0x6   : > { %s2276_s28 = scalar_select %p21_p0, %s2192_s22, %s23_s27  }
   0x7   : > { %p32_p4 = por %p31_p2, %p30_p1  ;;  %p2278_p5 = por %p165_p3, %p30_p1 }
   0x8   : > { %p2003_p6 = scmp.ge.s32.totalorder %s2196_s23, 2 }
   0xa   : > { %202 = sbr.rel (%p2003_p6) target bundleno = 29 (0x1d), region = 36 }
  0x11   : > { %205 = sbr.rel (!%p32_p4) target bundleno = 29 (0x1d), region = 40  ;;  %s207_s30 = sand.u32 (%p32_p4), 1, %s2192_s22  }
  0x12   : > { %s2031_s7 = sshll.u32 (%p32_p4), %s2196_s23, 6  ;;  %s2004_s8 = sshll.u32 (%p32_p4), %s207_s30, 7 }
  0x13   : > { %s2288_s11 = scalar_lea.vmem (%p32_p4), %s3138_s0, %s2031_s7  ;;  %s209_s12 = scalar_lea.vmem (%p32_p4), [#allocation2], %s2004_s8 }
  0x14   : > { %v225_v0 = vld [vmem:[%s2288_s11] sm:$0xff] (%p32_p4)  ;;  %v227_v1 = vld [vmem:[%s2288_s11 + $0x8] sm:$0xff] (%p32_p4)  ;;  %v229_v2 = vld [vmem:[%s2288_s11 + $0x10] sm:$0xff] (%p32_p4) }
  0x15   : > { %226 = vst [vmem:[%s209_s12] sm:$0xff] (%p32_p4), %v225_v0  ;;  %228 = vst [vmem:[%s209_s12 + $0x8] sm:$0xff] (%p32_p4), %v227_v1  ;;  %v231_v3 = vld [vmem:[%s2288_s11 + $0x18] sm:$0xff] (%p32_p4)  ;;  %v233_v4 = vld [vmem:[%s2288_s11 + $0x20] sm:$0xff] (%p32_p4) }
  0x16   : > { %230 = vst [vmem:[%s209_s12 + $0x10] sm:$0xff] (%p32_p4), %v229_v2  ;;  %v235_v5 = vld [vmem:[%s2288_s11 + $0x28] sm:$0xff] (%p32_p4)  ;;  %232 = vst [vmem:[%s209_s12 + $0x18] sm:$0xff] (%p32_p4), %v231_v3  ;;  %v237_v6 = vld [vmem:[%s2288_s11 + $0x30] sm:$0xff] (%p32_p4) }
  0x17   : > { %234 = vst [vmem:[%s209_s12 + $0x20] sm:$0xff] (%p32_p4), %v233_v4  ;;  %236 = vst [vmem:[%s209_s12 + $0x28] sm:$0xff] (%p32_p4), %v235_v5  ;;  %v239_v7 = vld [vmem:[%s2288_s11 + $0x38] sm:$0xff] (%p32_p4)  ;;  %v241_v8 = vld [vmem:[%s2288_s11 + $0x80] sm:$0xff] (%p32_p4) }
  0x18   : > { %238 = vst [vmem:[%s209_s12 + $0x30] sm:$0xff] %v237_v6  ;;  %240 = vst [vmem:[%s209_s12 + $0x38] sm:$0xff] %v239_v7  ;;  %v243_v9 = vld [vmem:[%s2288_s11 + $0x88] sm:$0xff]  ;;  %v245_v10 = vld [vmem:[%s2288_s11 + $0x90] sm:$0xff] }
  0x19   : > { %242 = vst [vmem:[%s209_s12 + $0x40] sm:$0xff] %v241_v8  ;;  %v247_v11 = vld [vmem:[%s2288_s11 + $0x98] sm:$0xff]  ;;  %244 = vst [vmem:[%s209_s12 + $0x48] sm:$0xff] %v243_v9  ;;  %v249_v12 = vld [vmem:[%s2288_s11 + $0xa0] sm:$0xff] }
  0x1a   : > { %246 = vst [vmem:[%s209_s12 + $0x50] sm:$0xff] %v245_v10  ;;  %248 = vst [vmem:[%s209_s12 + $0x58] sm:$0xff] %v247_v11  ;;  %v251_v13 = vld [vmem:[%s2288_s11 + $0xa8] sm:$0xff]  ;;  %v253_v14 = vld [vmem:[%s2288_s11 + $0xb0] sm:$0xff] }
  0x1b   : > { %250 = vst [vmem:[%s209_s12 + $0x60] sm:$0xff] %v249_v12  ;;  %252 = vst [vmem:[%s209_s12 + $0x68] sm:$0xff] %v251_v13  ;;  %v255_v15 = vld [vmem:[%s2288_s11 + $0xb8] sm:$0xff] }
  0x1c   : > { %254 = vst [vmem:[%s209_s12 + $0x70] sm:$0xff] %v253_v14  ;;  %256 = vst [vmem:[%s209_s12 + $0x78] sm:$0xff] %v255_v15 }
  0x1d PF: > { %p2007_p7 = scmp.ge.s32.totalorder %s2196_s23, 1  ;;  %p261_p8 = scmp.lt.s32.totalorder %s2196_s23, 3 }
  0x1f   : > { %p262_p9 = pnand %p2007_p7, %p261_p8 }
  0x21   : > { %265 = sbr.rel (%p262_p9) target bundleno = 1099 (0x44b), region = 63 }
  0x28   : > { %v2311_v16 = vld [vmem:[%s3139_s1] sm:$0xff]  ;;  %v2198_v17 = vmov 1   ;;  %v2199_v18 = vmov 0   ;;  %v315_v19 = vld [vmem:[%s3139_s1 + $0x8] sm:$0xff]  ;;  %v3145_v20 = vmov 0.0   ;;  %v2201_v21 = vmov 2  }
  0x29   : > { %2153 = vset.pattern.permute.xlu1 %v2198_v17  ;;  %2152 = vset.pattern.permute.xlu0 %v2199_v18  ;;  %v2202_v22 = vmov 3   ;;  %s268_s17 = sand.u32 1, %s2188_s21   ;;  %vm391_vm0 = vcmask 130048   ;;  %s2203_s26 = smov 127   ;;  %vm1234_vm9 = vcmask 588800   ;;  %vm1556_vm10 = vcmask 64512  }
  0x2a   : > { %351 = vperm.xlu1 %2153, %v2311_v16   ;;  %326 = vperm.xlu0 %2152, %v2311_v16   ;;  %s2323_s18 = sshll.u32 %s268_s17, 7  ;;  %s2204_s27 = smov 17  }
  0x2b   : > { %459 = vmatprep.mubr.f32.mxu0 %v3145_v20  ;;  %530 = vmatprep.mubr.f32.mxu1 %v3145_v20  ;;  %s2326_s19 = scalar_lea.vmem [#allocation2], %s2323_s18  ;;  %s2205_s30 = smov 113  }
  0x2c   : > { %v299_v23 = vld [vmem:[%s2326_s19 + $0x8] sm:$0xff]  ;;  %v301_v24 = vld [vmem:[%s2326_s19 + $0x18] sm:$0xff]  ;;  %v298_v25 = vld [vmem:[%s2326_s19] sm:$0xff]  ;;  %s2206_s7 = smov 111   ;;  %s2207_s8 = smov 16  }
  0x2d   : > { %v300_v26 = vld [vmem:[%s2326_s19 + $0x10] sm:$0xff]  ;;  %v303_v27 = vld [vmem:[%s2326_s19 + $0x28] sm:$0xff]  ;;  %v305_v28 = vld [vmem:[%s2326_s19 + $0x38] sm:$0xff]  ;;  %s2208_s9 = smov 15   ;;  %s2209_s10 = smov 1  }
  0x2e   : > { %355 = vperm.xlu1 %2153, %v315_v19   ;;  %331 = vperm.xlu0 %2152, %v315_v19   ;;  %v302_v29 = vld [vmem:[%s2326_s19 + $0x20] sm:$0xff]  ;;  %v304_v30 = vld [vmem:[%s2326_s19 + $0x30] sm:$0xff]  ;;  %v307_v37 = vld [vmem:[%s2326_s19 + $0x48] sm:$0xff]  ;;  %s2210_s11 = smov 112   ;;  %s3073_s20 = scalar_lea.vmem [#allocation3], %s2323_s18 }
  0x2f   : > { %v309_v38 = vld [vmem:[%s2326_s19 + $0x58] sm:$0xff]  ;;  %v306_v45 = vld [vmem:[%s2326_s19 + $0x40] sm:$0xff]  ;;  %v308_v47 = vld [vmem:[%s2326_s19 + $0x50] sm:$0xff]  ;;  %s2032_s18 = sshll.u32 (%p2278_p5), %s2000_s24, 6 }
  0x30   : > { %v311_v50 = vld [vmem:[%s2326_s19 + $0x68] sm:$0xff]  ;;  %v313_v57 = vld [vmem:[%s2326_s19 + $0x78] sm:$0xff]  ;;  %v310_v0 = vld [vmem:[%s2326_s19 + $0x60] sm:$0xff]  ;;  %s1896_s29 = scalar_lea.vmem (%p2278_p5), %s3144_s6, %s2032_s18 }
  0x31   : > { %v312_v13 = vld [vmem:[%s2326_s19 + $0x70] sm:$0xff] }
  0x32   : > { %2154 = vset.pattern.permute.xlu0 %v2201_v21  ;;  %2155 = vset.pattern.permute.xlu1 %v2202_v22 }
  0x33   : > { %680 = vperm.xlu0 %2154, %v2311_v16   ;;  %692 = vperm.xlu1 %2155, %v2311_v16  }
  0xa9   : > { %v352_v31 = vpop.permute.xlu1 %351  ;;  %v327_v32 = vpop.permute.xlu0 %326 }
  0xaa   : > { %v335_v33 = vmul.f32 %v327_v32, %v299_v23  ;;  %v337_v34 = vmul.f32 %v327_v32, %v301_v24  ;;  %v334_v35 = vmul.f32 %v327_v32, %v298_v25  ;;  %v336_v36 = vmul.f32 %v327_v32, %v300_v26 }
  0xab   : > { %v339_v39 = vmul.f32 %v327_v32, %v303_v27  ;;  %v341_v40 = vmul.f32 %v327_v32, %v305_v28  ;;  %v338_v41 = vmul.f32 %v327_v32, %v302_v29  ;;  %v340_v42 = vmul.f32 %v327_v32, %v304_v30 }
  0xac   : > { %v359_v43 = vadd.f32 %v352_v31, %v335_v33  ;;  %v361_v44 = vadd.f32 %v352_v31, %v337_v34  ;;  %v358_v46 = vadd.f32 %v352_v31, %v334_v35  ;;  %v360_v48 = vadd.f32 %v352_v31, %v336_v36 }
  0xad   : > { %v332_v49 = vpop.permute.xlu0 %331  ;;  %v363_v51 = vadd.f32 %v352_v31, %v339_v39  ;;  %v365_v52 = vadd.f32 %v352_v31, %v341_v40  ;;  %v362_v53 = vadd.f32 %v352_v31, %v338_v41  ;;  %v364_v58 = vadd.f32 %v352_v31, %v340_v42  ;;  %v356_v59 = vpop.permute.xlu1 %355  ;;  %v390_v31 = vld [vmem:[%s3141_s3] sm:$0xff] }
  0xae   : > { %v343_v54 = vmul.f32 %v332_v49, %v307_v37  ;;  %v375_v55 = vmax.f32 %v359_v43, 0.0  ;;  %v345_v56 = vmul.f32 %v332_v49, %v309_v38  ;;  %v377_v60 = vmax.f32 %v361_v44, 0.0 }
  0xaf   : > { %v342_v61 = vmul.f32 %v332_v49, %v306_v45  ;;  %v374_v62 = vmax.f32 %v358_v46, 0.0  ;;  %v344_v63 = vmul.f32 %v332_v49, %v308_v47  ;;  %v376_v3 = vmax.f32 %v360_v48, 0.0 }
  0xb0   : > { %v367_v1 = vadd.f32 %v356_v59, %v343_v54  ;;  %v369_v2 = vadd.f32 %v356_v59, %v345_v56  ;;  %v347_v4 = vmul.f32 %v332_v49, %v311_v50  ;;  %v379_v7 = vmax.f32 %v363_v51, 0.0 }
  0xb1   : > { %v366_v5 = vadd.f32 %v356_v59, %v342_v61  ;;  %v368_v6 = vadd.f32 %v356_v59, %v344_v63  ;;  %v349_v8 = vmul.f32 %v332_v49, %v313_v57  ;;  %v346_v12 = vmul.f32 %v332_v49, %v310_v0 }
  0xb2   : > { %v383_v9 = vmax.f32 %v367_v1, 0.0  ;;  %v385_v10 = vmax.f32 %v369_v2, 0.0  ;;  %v371_v11 = vadd.f32 %v356_v59, %v347_v4  ;;  %v381_v18 = vmax.f32 %v365_v52, 0.0  ;;  %v2355_v38 = vpop.permute.xlu0 %680  ;;  %v2357_v39 = vpop.permute.xlu1 %692 }
  0xb3   : > { %v382_v14 = vmax.f32 %v366_v5, 0.0  ;;  %v384_v15 = vmax.f32 %v368_v6, 0.0  ;;  %v373_v17 = vadd.f32 %v356_v59, %v349_v8  ;;  %v370_v23 = vadd.f32 %v356_v59, %v346_v12 }
  0xb4   : > { %v2033_v19 = vpack.c.bf16 %v383_v9, %v375_v55  ;;  %v2037_v21 = vpack.c.bf16 %v385_v10, %v377_v60  ;;  %v387_v22 = vmax.f32 %v371_v11, 0.0  ;;  %v348_v27 = vmul.f32 %v332_v49, %v312_v13 }
  0xb5   : > { %v2035_v24 = vpack.c.bf16 %v382_v14, %v374_v62  ;;  %v2039_v25 = vpack.c.bf16 %v384_v15, %v376_v3  ;;  %v389_v26 = vmax.f32 %v373_v17, 0.0  ;;  %v386_v29 = vmax.f32 %v370_v23, 0.0 }
  0xb6   : > { %2034 = vmatprep.subr.bf16.mxu0 %v2033_v19  ;;  %2038 = vmatprep.subr.bf16.mxu1 %v2037_v21  ;;  %v2041_v28 = vpack.c.bf16 %v387_v22, %v379_v7  ;;  %v378_v32 = vmax.f32 %v362_v53, 0.0  ;;  %v372_v33 = vadd.f32 %v356_v59, %v348_v27  ;;  %v380_v35 = vmax.f32 %v364_v58, 0.0 }
  0xb7   : > { %2036 = vmatpush1.bf16.msra.mxu0 %v2035_v24  ;;  %2040 = vmatpush1.bf16.msra.mxu1 %v2039_v25  ;;  %v2045_v30 = vpack.c.bf16 %v389_v26, %v381_v18  ;;  %v2211_v12 = vmov 4   ;;  %v2212_v13 = vmov 5   ;;  %v727_v14 = vlaneseq  ;;  %v2547_v25 = vld [vmem:[%s3140_s2 + $0x8] sm:$0xff] }
  0xb8   : > { %2042 = vmatprep.subr.bf16.mxu0 %v2041_v28  ;;  %v2043_v34 = vpack.c.bf16 %v386_v29, %v378_v32  ;;  %v388_v36 = vmax.f32 %v372_v33, 0.0  ;;  %2156 = vset.pattern.permute.xlu1 %v2211_v12  ;;  %v2559_v29 = vld [vmem:[%s3140_s2 + $0x18] sm:$0xff] }
  0xb9   : > { %2046 = vmatprep.subr.bf16.mxu1 %v2045_v30  ;;  %2157 = vset.pattern.permute.xlu0 %v2212_v13  ;;  %v2532_v18 = vshrl.u32 %v727_v14, 7  ;;  %v2534_v21 = vand.u32 127, %v727_v14 }
  0xba   : > { %2010 = vmatmul.mubr.msk.f32.vlgmr.msra.gmra.mrb[0].mxu0 %vm391_vm0, %v390_v31  ;;  %2011 = vmatmul.mubr.msk.f32.vlgmr.msra.gmra.mrb[0].mxu1 %vm391_vm0, %v390_v31  ;;  %v2047_v37 = vpack.c.bf16 %v388_v36, %v380_v35 }
  0xbb   : > { %2044 = vmatpush1.bf16.msra.mxu0 %v2043_v34  ;;  %601 = vmatprep.mubr.f32.mxu0 %v3145_v20  ;;  %v2537_v23 = vsub.s32 0, %v2532_v18  ;;  %v2540_v24 = vsub.s32 1, %v2532_v18  ;;  %vm729_vm1 = vcmp.lt.s32.totalorder %v2534_v21, 17  ;;  %vm794_vm2 = vcmp.lt.s32.totalorder %v2534_v21, 16 }
  0xbc   : > { %672 = vmatprep.mubr.f32.mxu1 %v3145_v20  ;;  %2048 = vmatpush1.bf16.msra.mxu1 %v2047_v37  ;;  %vm924_vm3 = vcmp.lt.s32.totalorder %v2534_v21, 1  ;;  %vm859_vm4 = vcmp.lt.s32.totalorder %v2534_v21, 15  ;;  %vm989_vm5 = vcmp.lt.s32.totalorder %v2534_v21, 127  ;;  %vm1119_vm6 = vcmp.lt.s32.totalorder %v2534_v21, 112 }
  0xbd   : > { %v745_v28 = vrot.slane %v2547_v25, %v2537_v23  ;;  %v753_v34 = vrot.slane %v2559_v29, %v2537_v23  ;;  %vm1054_vm7 = vcmp.lt.s32.totalorder %v2534_v21, 113  ;;  %vm1184_vm8 = vcmp.lt.s32.totalorder %v2534_v21, 111 }
  0xbe   : > { %2012 = vmatmul.mubr.msk.f32.vlgmr.msra.gmra.mrb[2].mxu0 %vm391_vm0, %v390_v31 }
  0xbf   : > { %1302 = vmatprep.mubr.f32.mxu0 %v3145_v20  ;;  %2013 = vmatmul.mubr.msk.f32.vlgmr.msra.gmra.mrb[2].mxu1 %vm391_vm0, %v390_v31  ;;  %v2570_v31 = vld [vmem:[%s3140_s2 + $0x10] sm:$0xff] }
  0xc0   : > { %1373 = vmatprep.mubr.f32.mxu1 %v3145_v20  ;;  %v814_v35 = vrot.slane %v2570_v31, %v2540_v24 }
 0x18d   : > { %v461_v40 = vpop.f32.mrb[0].mxu0  ;;  %v532_v41 = vpop.f32.mrb[0].mxu1 }
 0x18e   : > { %v683_v42 = vmul.f32 %v2355_v38, %v461_v40  ;;  %v685_v43 = vmul.f32 %v2355_v38, %v532_v41  ;;  %v463_v44 = vpop.f32.mrb[1].mxu0  ;;  %v534_v45 = vpop.f32.mrb[1].mxu1  ;;  %v818_v40 = vrot.slane %v2559_v29, %v2540_v24  ;;  %v749_v41 = vrot.slane %v2570_v31, %v2537_v23 }
 0x18f   : > { %v684_v54 = vmul.f32 %v2355_v38, %v463_v44  ;;  %v686_v55 = vmul.f32 %v2355_v38, %v534_v45 }
 0x190   : > { %v695_v46 = vadd.f32 %v2357_v39, %v683_v42  ;;  %v697_v47 = vadd.f32 %v2357_v39, %v685_v43 }
 0x191   : > { %v603_v48 = vpop.f32.mrb[2].mxu0  ;;  %v696_v56 = vadd.f32 %v2357_v39, %v684_v54  ;;  %v698_v57 = vadd.f32 %v2357_v39, %v686_v55 }
 0x192   : > { %v2363_v49 = vmax.f32 %v695_v46, 0.0  ;;  %v2365_v50 = vmax.f32 %v697_v47, 0.0  ;;  %v2367_v51 = vpop.f32.mrb[3].mxu0  ;;  %v674_v52 = vpop.f32.mrb[2].mxu1  ;;  %v687_v60 = vmul.f32 %v2355_v38, %v603_v48 }
 0x193   : > { %v676_v53 = vpop.f32.mrb[3].mxu1  ;;  %v2385_v58 = vmax.f32 %v696_v56, 0.0  ;;  %v2391_v59 = vmax.f32 %v698_v57, 0.0  ;;  %v689_v63 = vmul.f32 %v2355_v38, %v674_v52  ;;  %v688_v5 = vmul.f32 %v2355_v38, %v2367_v51 }
 0x194   : > { %977 = vrot.lane.b32.xlu0 %v2365_v50, %s2203_s26  ;;  %711 = vrot.lane.b32.xlu1 %v2363_v49, %s2204_s27  ;;  %v699_v61 = vadd.f32 %v2357_v39, %v687_v60  ;;  %v690_v2 = vmul.f32 %v2355_v38, %v676_v53 }
 0x195   : > { %v701_v0 = vadd.f32 %v2357_v39, %v689_v63  ;;  %v700_v6 = vadd.f32 %v2357_v39, %v688_v5  ;;  %v2604_v63 = vsub.s32 3, %v2532_v18 }
 0x196   : > { %v2439_v62 = vmax.f32 %v699_v61, 0.0  ;;  %v702_v3 = vadd.f32 %v2357_v39, %v690_v2 }
 0x197   : > { %v2455_v1 = vmax.f32 %v701_v0, 0.0  ;;  %v2492_v7 = vmax.f32 %v700_v6, 0.0  ;;  %v2607_v0 = vsub.s32 2, %v2532_v18  ;;  %v944_v5 = vrot.slane %v2570_v31, %v2604_v63 }
 0x198   : > { %1038 = vrot.lane.b32.xlu0 %v2363_v49, %s2205_s30  ;;  %715 = vrot.lane.b32.xlu1 %v2365_v50, %s2204_s27  ;;  %3161 = vst [vmem:[#allocation4_spill] sm:$0xff] %v2439_v62  ;;  %v2475_v4 = vmax.f32 %v702_v3, 0.0  ;;  %v948_v12 = vrot.slane %v2559_v29, %v2604_v63 }
 0x199   : > { %3162 = vst [vmem:[#allocation5_spill] sm:$0xff] %v2455_v1  ;;  %3164 = vst [vmem:[#allocation7_spill] sm:$0xff] %v2492_v7  ;;  %v883_v6 = vrot.slane %v2559_v29, %v2607_v0  ;;  %v879_v13 = vrot.slane %v2570_v31, %v2607_v0 }
 0x19a   : > { %3163 = vst [vmem:[#allocation6_spill] sm:$0xff] %v2475_v4 }
 0x19c   : > { %1168 = vrot.lane.b32.xlu0 %v2363_v49, %s2206_s7  ;;  %778 = vrot.lane.b32.xlu1 %v2363_v49, %s2207_s8 }
 0x1a0   : > { %782 = vrot.lane.b32.xlu1 %v2365_v50, %s2207_s8  ;;  %713 = vrot.lane.b32.xlu0 %v2385_v58, %s2204_s27 }
 0x1a4   : > { %843 = vrot.lane.b32.xlu1 %v2363_v49, %s2208_s9  ;;  %717 = vrot.lane.b32.xlu0 %v2391_v59, %s2204_s27 }
 0x1a8   : > { %847 = vrot.lane.b32.xlu1 %v2365_v50, %s2208_s9  ;;  %780 = vrot.lane.b32.xlu0 %v2385_v58, %s2207_s8 }
 0x1ac   : > { %908 = vrot.lane.b32.xlu1 %v2363_v49, %s2209_s10  ;;  %784 = vrot.lane.b32.xlu0 %v2391_v59, %s2207_s8 }
 0x1b0   : > { %912 = vrot.lane.b32.xlu1 %v2365_v50, %s2209_s10  ;;  %845 = vrot.lane.b32.xlu0 %v2385_v58, %s2208_s9 }
 0x1b4   : > { %973 = vrot.lane.b32.xlu1 %v2363_v49, %s2203_s26  ;;  %849 = vrot.lane.b32.xlu0 %v2391_v59, %s2208_s9 }
 0x1b8   : > { %1042 = vrot.lane.b32.xlu1 %v2365_v50, %s2205_s30  ;;  %910 = vrot.lane.b32.xlu0 %v2385_v58, %s2209_s10 }
 0x1bc   : > { %1107 = vrot.lane.b32.xlu1 %v2365_v50, %s2210_s11  ;;  %914 = vrot.lane.b32.xlu0 %v2391_v59, %s2209_s10 }
 0x1c0   : > { %1103 = vrot.lane.b32.xlu1 %v2363_v49, %s2210_s11  ;;  %1040 = vrot.lane.b32.xlu0 %v2385_v58, %s2205_s30 }
 0x1c4   : > { %1172 = vrot.lane.b32.xlu1 %v2365_v50, %s2206_s7  ;;  %1044 = vrot.lane.b32.xlu0 %v2391_v59, %s2205_s30 }
 0x1c8   : > { %975 = vrot.lane.b32.xlu1 %v2385_v58, %s2203_s26  ;;  %1105 = vrot.lane.b32.xlu0 %v2385_v58, %s2210_s11 }
 0x1cc   : > { %979 = vrot.lane.b32.xlu1 %v2391_v59, %s2203_s26  ;;  %1109 = vrot.lane.b32.xlu0 %v2391_v59, %s2210_s11 }
 0x1d0   : > { %1170 = vrot.lane.b32.xlu0 %v2385_v58, %s2206_s7  ;;  %1046 = vrot.lane.b32.xlu1 %v2439_v62, %s2205_s30 }
 0x1d4   : > { %1174 = vrot.lane.b32.xlu0 %v2391_v59, %s2206_s7  ;;  %1111 = vrot.lane.b32.xlu1 %v2439_v62, %s2210_s11 }
 0x1d8   : > { %786 = vrot.lane.b32.xlu1 %v2439_v62, %s2207_s8  ;;  %981 = vrot.lane.b32.xlu0 %v2439_v62, %s2203_s26 }
 0x1dc   : > { %790 = vrot.lane.b32.xlu1 %v2455_v1, %s2207_s8  ;;  %719 = vrot.lane.b32.xlu0 %v2439_v62, %s2204_s27 }
 0x1e0   : > { %1176 = vrot.lane.b32.xlu1 %v2439_v62, %s2206_s7  ;;  %723 = vrot.lane.b32.xlu0 %v2455_v1, %s2204_s27 }
 0x1e4   : > { %851 = vrot.lane.b32.xlu1 %v2439_v62, %s2208_s9  ;;  %916 = vrot.lane.b32.xlu0 %v2439_v62, %s2209_s10 }
 0x1e8   : > { %855 = vrot.lane.b32.xlu1 %v2455_v1, %s2208_s9  ;;  %920 = vrot.lane.b32.xlu0 %v2455_v1, %s2209_s10 }
 0x1ec   : > { %725 = vrot.lane.b32.xlu1 %v2475_v4, %s2204_s27  ;;  %792 = vrot.lane.b32.xlu0 %v2475_v4, %s2207_s8 }
 0x1f0   : > { %857 = vrot.lane.b32.xlu1 %v2475_v4, %s2208_s9  ;;  %922 = vrot.lane.b32.xlu0 %v2475_v4, %s2209_s10 }
 0x1f4   : > { %1050 = vrot.lane.b32.xlu1 %v2455_v1, %s2205_s30  ;;  %985 = vrot.lane.b32.xlu0 %v2455_v1, %s2203_s26 }
 0x1f8   : > { %1115 = vrot.lane.b32.xlu0 %v2455_v1, %s2210_s11  ;;  %721 = vrot.lane.b32.xlu1 %v2492_v7, %s2204_s27 }
 0x1fc   : > { %788 = vrot.lane.b32.xlu0 %v2492_v7, %s2207_s8  ;;  %918 = vrot.lane.b32.xlu1 %v2492_v7, %s2209_s10 }
 0x200   : > { %853 = vrot.lane.b32.xlu0 %v2492_v7, %s2208_s9  ;;  %983 = vrot.lane.b32.xlu1 %v2492_v7, %s2203_s26 }
 0x204   : > { %1048 = vrot.lane.b32.xlu0 %v2492_v7, %s2205_s30  ;;  %987 = vrot.lane.b32.xlu1 %v2475_v4, %s2203_s26 }
 0x206   : > { %v2510_v8 = vpop.permute.xlu0 %977  ;;  %v2512_v9 = vpop.permute.xlu1 %711 }
 0x208   : > { %1052 = vrot.lane.b32.xlu0 %v2475_v4, %s2205_s30  ;;  %1113 = vrot.lane.b32.xlu1 %v2492_v7, %s2210_s11 }
 0x20a   : > { %v2518_v10 = vpop.permute.xlu0 %1038  ;;  %v716_v11 = vpop.permute.xlu1 %715 }
 0x20c   : > { %1178 = vrot.lane.b32.xlu0 %v2492_v7, %s2206_s7  ;;  %1117 = vrot.lane.b32.xlu1 %v2475_v4, %s2210_s11 }
 0x20e   : > { %v2524_v15 = vpop.permute.xlu0 %1168  ;;  %v2526_v17 = vpop.permute.xlu1 %778 }
 0x210   : > { %1182 = vrot.lane.b32.xlu0 %v2475_v4, %s2206_s7  ;;  %1180 = vrot.lane.b32.xlu1 %v2455_v1, %s2206_s7 }
 0x212   : > { %v783_v19 = vpop.permute.xlu1 %782  ;;  %v714_v22 = vpop.permute.xlu0 %713 }
 0x213   : > { %v736_v30 = vsel %vm729_vm1, %v2512_v9, %v714_v22  ;;  %v735_v43 = vsel %vm729_vm1, %v714_v22, %v716_v11 }
 0x214   : > { %1523 = vperm.xlu1 %2156, %v2311_v16   ;;  %1535 = vperm.xlu0 %2157, %v2311_v16   ;;  %v810_v16 = vrot.slane %v2547_v25, %v2540_v24  ;;  %v771_v37 = vmul.f32 %v745_v28, %v736_v30  ;;  %v772_v53 = vmul.f32 %v749_v41, %v735_v43 }
 0x216   : > { %v2550_v26 = vpop.permute.xlu1 %843  ;;  %v2552_v27 = vpop.permute.xlu0 %717 }
 0x217   : > { %v734_v42 = vsel %vm729_vm1, %v716_v11, %v2552_v27 }
 0x218   : > { %v773_v51 = vmul.f32 %v753_v34, %v734_v42 }
 0x21a   : > { %v848_v32 = vpop.permute.xlu1 %847  ;;  %v781_v33 = vpop.permute.xlu0 %780 }
 0x21b   : > { %v801_v36 = vsel %vm794_vm2, %v2526_v17, %v781_v33  ;;  %v800_v38 = vsel %vm794_vm2, %v781_v33, %v783_v19 }
 0x21c   : > { %v836_v39 = vmul.f32 %v810_v16, %v801_v36  ;;  %v837_v47 = vmul.f32 %v814_v35, %v800_v38 }
 0x21e   : > { %v2590_v44 = vpop.permute.xlu1 %908  ;;  %v2592_v45 = vpop.permute.xlu0 %784  ;;  %v2049_v46 = vpack.c.bf16 %v836_v39, %v771_v37  ;;  %v2067_v57 = vpack.c.bf16 %v837_v47, %v772_v53 }
 0x21f   : > { %v799_v48 = vsel %vm794_vm2, %v783_v19, %v2592_v45 }
 0x220   : > { %v838_v52 = vmul.f32 %v818_v40, %v799_v48  ;;  %2050 = vmatprep.subr.bf16.mxu0 %v2049_v46 }
 0x222   : > { %v913_v54 = vpop.permute.xlu1 %912  ;;  %v2597_v55 = vpop.permute.xlu0 %845  ;;  %v2065_v56 = vpack.c.bf16 %v838_v52, %v773_v51 }
 0x223   : > { %v865_v19 = vsel %vm859_vm4, %v2597_v55, %v848_v32 }
 0x224   : > { %2066 = vmatprep.subr.bf16.mxu1 %v2065_v56  ;;  %v902_v35 = vmul.f32 %v879_v13, %v865_v19  ;;  %v2666_v56 = vsub.s32 6, %v2532_v18 }
 0x225   : > { %2068 = vmatpush1.bf16.msra.mxu1 %v2067_v57 }
 0x226   : > { %v2599_v60 = vpop.permute.xlu1 %973  ;;  %v2601_v61 = vpop.permute.xlu0 %849  ;;  %v1143_v13 = vrot.slane %v2559_v29, %v2666_v56 }
 0x227   : > { %v864_v14 = vsel %vm859_vm4, %v848_v32, %v2601_v61  ;;  %v2644_v32 = vsub.s32 4, %v2532_v18 }
 0x228   : > { %v903_v33 = vmul.f32 %v883_v6, %v864_v14  ;;  %v2671_v6 = vsub.s32 5, %v2532_v18  ;;  %v2684_v14 = vld [vmem:[%s3140_s2 + $0x20] sm:$0xff] }
 0x229   : > { %v1005_v42 = vrot.slane %v2547_v25, %v2644_v32  ;;  %v1013_v19 = vrot.slane %v2559_v29, %v2644_v32 }
 0x22a   : > { %v2610_v2 = vpop.permute.xlu1 %1042  ;;  %v2612_v3 = vpop.permute.xlu0 %910 }
 0x22b   : > { %v930_v11 = vsel %vm924_vm3, %v2612_v3, %v913_v54 }
 0x22c   : > { %v967_v16 = vmul.f32 %v944_v5, %v930_v11  ;;  %v1009_v11 = vrot.slane %v2570_v31, %v2644_v32 }
 0x22e   : > { %v2632_v22 = vpop.permute.xlu1 %1107  ;;  %v2634_v28 = vpop.permute.xlu0 %914  ;;  %v2071_v39 = vpack.c.bf16 %v967_v16, %v902_v35 }
 0x22f   : > { %v929_v30 = vsel %vm924_vm3, %v913_v54, %v2634_v28 }
 0x230   : > { %v968_v34 = vmul.f32 %v948_v12, %v929_v30  ;;  %v1078_v30 = vrot.slane %v2559_v29, %v2671_v6 }
 0x232   : > { %v2639_v36 = vpop.permute.xlu1 %1103  ;;  %v2641_v37 = vpop.permute.xlu0 %1040  ;;  %v2069_v38 = vpack.c.bf16 %v968_v34, %v903_v33 }
 0x234   : > { %2070 = vmatprep.subr.bf16.mxu1 %v2069_v38 }
 0x235   : > { %2072 = vmatpush1.bf16.msra.mxu1 %v2071_v39  ;;  %v822_v39 = vrot.slane %v2684_v14, %v2540_v24 }
 0x236   : > { %v2646_v40 = vpop.permute.xlu1 %1172  ;;  %v1045_v41 = vpop.permute.xlu0 %1044 }
 0x23a   : > { %v2651_v43 = vpop.permute.xlu1 %975  ;;  %v2653_v46 = vpop.permute.xlu0 %1105 }
 0x23b   : > { %v995_v47 = vsel %vm989_vm5, %v2651_v43, %v2510_v8 }
 0x23c   : > { %v2659_v48 = vmul.f32 %v1005_v42, %v995_v47 }
 0x23e   : > { %v980_v51 = vpop.permute.xlu1 %979  ;;  %v1110_v52 = vpop.permute.xlu0 %1109 }
 0x23f   : > { %v994_v12 = vsel %vm989_vm5, %v2510_v8, %v980_v51  ;;  %v1139_v8 = vrot.slane %v2570_v31, %v2666_v56  ;;  %v1124_v47 = vsel %vm1119_vm6, %v2632_v22, %v1110_v52 }
 0x240   : > { %v1032_v35 = vmul.f32 %v1009_v11, %v994_v12  ;;  %v757_v11 = vrot.slane %v2684_v14, %v2537_v23  ;;  %v1074_v12 = vrot.slane %v2570_v31, %v2671_v6 }
 0x241   : > { %v1162_v4 = vmul.f32 %v1139_v8, %v1124_v47 }
 0x242   : > { %v2661_v53 = vpop.permute.xlu0 %1170  ;;  %v2663_v54 = vpop.permute.xlu1 %1046 }
 0x243   : > { %3165 = vst [vmem:[#allocation8_spill] sm:$0xff] %v2663_v54  ;;  %v1058_v38 = vsel %vm1054_vm7, %v1045_v41, %v2663_v54 }
 0x246   : > { %v1175_v57 = vpop.permute.xlu0 %1174  ;;  %v2668_v5 = vpop.permute.xlu1 %1111 }
 0x247   : > { %3166 = vst [vmem:[#allocation9_spill] sm:$0xff] %v2668_v5  ;;  %v1123_v16 = vsel %vm1119_vm6, %v1110_v52, %v2668_v5  ;;  %v2723_v5 = vsub.s32 7, %v2532_v18  ;;  %v1098_v52 = vmul.f32 %v1078_v30, %v1058_v38 }
 0x248   : > { %v1163_v20 = vmul.f32 %v1143_v13, %v1123_v16 }
 0x249   : > { %v1208_v18 = vrot.slane %v2559_v29, %v2723_v5  ;;  %v1189_v29 = vsel %vm1184_vm8, %v2646_v40, %v1175_v57 }
 0x24a   : > { %v2696_v33 = vpop.permute.xlu1 %786  ;;  %v2698_v34 = vpop.permute.xlu0 %981  ;;  %v2077_v30 = vpack.c.bf16 %v1163_v20, %v1098_v52 }
 0x24b   : > { %v993_v42 = vsel %vm989_vm5, %v980_v51, %v2698_v34  ;;  %v798_v54 = vsel %vm794_vm2, %v2592_v45, %v2696_v33  ;;  %v1059_v51 = vsel %vm1054_vm7, %v2610_v2, %v1045_v41 }
 0x24c   : > { %v1033_v62 = vmul.f32 %v1013_v19, %v993_v42  ;;  %v2075_v42 = vpack.c.bf16 %v1032_v35, %v2365_v50  ;;  %v2735_v7 = vmul.f32 %v822_v39, %v798_v54  ;;  %v1097_v38 = vmul.f32 %v1074_v12, %v1059_v51  ;;  %v2775_v12 = vld [vmem:[%s3142_s4] sm:$0xff] }
 0x24d   : > { %v1204_v54 = vrot.slane %v2570_v31, %v2723_v5  ;;  %v887_v35 = vrot.slane %v2684_v14, %v2607_v0  ;;  %v952_v39 = vrot.slane %v2684_v14, %v2604_v63  ;;  %3170 = vst [vmem:[#allocation13_spill] sm:$0xff] %v2775_v12 }
 0x24e   : > { %v2725_v13 = vpop.permute.xlu1 %790  ;;  %v2727_v19 = vpop.permute.xlu0 %719  ;;  %v2073_v16 = vpack.c.bf16 %v1033_v62, %v2391_v59  ;;  %3167 = vst [vmem:[#allocation10_spill] sm:$0xff] %v2735_v7 }
 0x24f   : > { %v733_v45 = vsel %vm729_vm1, %v2552_v27, %v2727_v19  ;;  %v2079_v27 = vpack.c.bf16 %v1162_v4, %v1097_v38  ;;  %v1227_v47 = vmul.f32 %v1204_v54, %v1189_v29  ;;  %v3173_v38 = vmov 0.0  }
 0x250   : > { %v2737_v41 = vmul.f32 %v757_v11, %v733_v45  ;;  %2074 = vmatprep.subr.bf16.mxu1 %v2073_v16  ;;  %v940_v16 = vrot.slane %v2547_v25, %v2604_v63 }
 0x251   : > { %2076 = vmatpush1.bf16.msra.mxu1 %v2075_v42 }
 0x252   : > { %3168 = vst [vmem:[#allocation11_spill] sm:$0xff] %v2737_v41  ;;  %v2744_v59 = vpop.permute.xlu1 %1176  ;;  %2078 = vmatprep.subr.bf16.mxu1 %v2077_v30  ;;  %v2746_v62 = vpop.permute.xlu0 %723  ;;  %v2803_v30 = vld [vmem:[%s3140_s2] sm:$0xff]  ;;  %v1135_v41 = vrot.slane %v2547_v25, %v2666_v56 }
 0x253   : > { %3169 = vst [vmem:[#allocation12_spill] sm:$0xff] %v2744_v59  ;;  %v1188_v20 = vsel %vm1184_vm8, %v1175_v57, %v2744_v59 }
 0x254   : > { %v1228_v8 = vmul.f32 %v1208_v18, %v1188_v20  ;;  %v931_v18 = vsel %vm924_vm3, %v2590_v44, %v2612_v3  ;;  %v806_v20 = vrot.slane %v2803_v30, %v2540_v24  ;;  %v875_v3 = vrot.slane %v2547_v25, %v2607_v0 }
 0x255   : > { %2080 = vmatpush1.bf16.msra.mxu1 %v2079_v27  ;;  %v741_v27 = vrot.slane %v2803_v30, %v2537_v23 }
 0x256   : > { %v2760_v4 = vpop.permute.xlu1 %851  ;;  %1325 = vmatprep.subr.mxu1 %v1228_v8  ;;  %v2762_v31 = vpop.permute.xlu0 %916  ;;  %v866_v8 = vsel %vm859_vm4, %v2550_v26, %v2597_v55 }
 0x257   : > { %v863_v11 = vsel %vm859_vm4, %v2601_v61, %v2760_v4  ;;  %v928_v57 = vsel %vm924_vm3, %v2634_v28, %v2762_v31  ;;  %v2784_v61 = vld [vmem:[%s3140_s2 + $0x38] sm:$0xff]  ;;  %v901_v1 = vmul.f32 %v875_v3, %v866_v8  ;;  %v2057_v3 = vpack.c.bf16 %v2659_v48, %v2385_v58 }
 0x258   : > { %v2777_v51 = vmul.f32 %v887_v35, %v863_v11  ;;  %v2779_v52 = vmul.f32 %v952_v39, %v928_v57  ;;  %v769_v54 = vrot.slane %v2784_v61, %v2537_v23  ;;  %v834_v29 = vrot.slane %v2784_v61, %v2540_v24 }
 0x259   : > { %1326 = vmatpush1.msra.mxu1 %v1227_v47  ;;  %v966_v35 = vmul.f32 %v940_v16, %v931_v18  ;;  %v871_v11 = vrot.slane %v2803_v30, %v2607_v0  ;;  %v936_v57 = vrot.slane %v2803_v30, %v2604_v63  ;;  %v1066_v8 = vrot.slane %v2803_v30, %v2671_v6 }
 0x25a   : > { %3171 = vst [vmem:[#allocation14_spill] sm:$0xff] %v2777_v51  ;;  %3172 = vst [vmem:[#allocation15_spill] sm:$0xff] %v2779_v52  ;;  %v2790_v42 = vpop.permute.xlu1 %855  ;;  %v2792_v45 = vpop.permute.xlu0 %920  ;;  %2015 = vmatmul.mubr.msk.f32.vlgmr.msra.gmra.mrb[4].mxu1 %vm1234_vm9, %v2775_v12  ;;  %v1061_v58 = vsel %vm1054_vm7, %v2518_v10, %v2641_v37 }
 0x25b   : > { %1515 = vmatprep.mubr.f32.mxu1 %v3173_v38  ;;  %v1001_v38 = vrot.slane %v2803_v30, %v2644_v32 }
 0x25e   : > { %v726_v39 = vpop.permute.xlu1 %725  ;;  %v793_v47 = vpop.permute.xlu0 %792 }
 0x25f   : > { %v730_v28 = vsel %vm729_vm1, %v2746_v62, %v726_v39  ;;  %v737_v50 = vsel %vm729_vm1, %v726_v39, %v2512_v9  ;;  %v795_v55 = vsel %vm794_vm2, %v2725_v13, %v793_v47  ;;  %v802_v16 = vsel %vm794_vm2, %v793_v47, %v2526_v17 }
 0x260   : > { %v770_v18 = vmul.f32 %v741_v27, %v737_v50  ;;  %v777_v59 = vmul.f32 %v769_v54, %v730_v28  ;;  %v835_v51 = vmul.f32 %v806_v20, %v802_v16  ;;  %v842_v52 = vmul.f32 %v834_v29, %v795_v55 }
 0x261   : > { %v996_v17 = vsel %vm989_vm5, %v2599_v60, %v2651_v43  ;;  %v2053_v27 = vpack.c.bf16 %v966_v35, %v901_v1  ;;  %v1070_v43 = vrot.slane %v2547_v25, %v2671_v6  ;;  %v1131_v1 = vrot.slane %v2803_v30, %v2666_v56 }
 0x262   : > { %v2051_v9 = vpack.c.bf16 %v835_v51, %v770_v18  ;;  %v858_v39 = vpop.permute.xlu1 %857  ;;  %v923_v7 = vpop.permute.xlu0 %922  ;;  %v2097_v12 = vpack.c.bf16 %v842_v52, %v777_v59  ;;  %v1125_v51 = vsel %vm1119_vm6, %v2653_v46, %v2632_v22  ;;  %v899_v35 = vrot.slane %v2784_v61, %v2607_v0 }
 0x263   : > { %v867_v50 = vsel %vm859_vm4, %v858_v39, %v2550_v26  ;;  %v932_v28 = vsel %vm924_vm3, %v923_v7, %v2590_v44  ;;  %v1060_v26 = vsel %vm1054_vm7, %v2641_v37, %v2610_v2  ;;  %v1030_v44 = vmul.f32 %v1001_v38, %v996_v17  ;;  %v2875_v2 = vld [vmem:[%s3140_s2 + $0x28] sm:$0xff]  ;;  %v2880_v38 = vld [vmem:[%s3140_s2 + $0x30] sm:$0xff] }
 0x264   : > { %v900_v59 = vmul.f32 %v871_v11, %v867_v50  ;;  %v965_v52 = vmul.f32 %v936_v57, %v932_v28  ;;  %2052 = vmatpush1.bf16.msra.mxu0 %v2051_v9  ;;  %2098 = vmatprep.subr.bf16.mxu1 %v2097_v12  ;;  %v1126_v12 = vsel %vm1119_vm6, %v2639_v36, %v2653_v46 }
 0x265   : > { %2054 = vmatprep.subr.bf16.mxu0 %v2053_v27  ;;  %v1161_v29 = vmul.f32 %v1135_v41, %v1125_v51  ;;  %v1196_v46 = vrot.slane %v2803_v30, %v2723_v5  ;;  %v1200_v41 = vrot.slane %v2547_v25, %v2723_v5  ;;  %v1096_v48 = vmul.f32 %v1070_v43, %v1060_v26 }
 0x266   : > { %v2055_v54 = vpack.c.bf16 %v965_v52, %v900_v59  ;;  %v2862_v20 = vpop.permute.xlu1 %1050  ;;  %v2864_v22 = vpop.permute.xlu0 %985  ;;  %v964_v47 = vrot.slane %v2784_v61, %v2604_v63  ;;  %v2059_v11 = vpack.c.bf16 %v1030_v44, %v2363_v49  ;;  %v1160_v30 = vmul.f32 %v1131_v1, %v1126_v12 }
 0x267   : > { %v761_v25 = vrot.slane %v2875_v2, %v2537_v23  ;;  %v765_v55 = vrot.slane %v2880_v38, %v2537_v23  ;;  %v1190_v16 = vsel %vm1184_vm8, %v2661_v53, %v2646_v40  ;;  %v2061_v18 = vpack.c.bf16 %v1161_v29, %v1096_v48 }
 0x268   : > { %2056 = vmatpush1.bf16.msra.mxu0 %v2055_v54  ;;  %v826_v9 = vrot.slane %v2875_v2, %v2540_v24  ;;  %v830_v49 = vrot.slane %v2880_v38, %v2540_v24  ;;  %v1095_v17 = vmul.f32 %v1066_v8, %v1061_v58  ;;  %v860_v50 = vsel %vm859_vm4, %v2790_v42, %v858_v39 }
 0x269   : > { %2058 = vmatprep.subr.bf16.mxu0 %v2057_v3  ;;  %v925_v23 = vsel %vm924_vm3, %v2792_v45, %v923_v7  ;;  %v956_v40 = vrot.slane %v2875_v2, %v2604_v63  ;;  %v960_v39 = vrot.slane %v2880_v38, %v2604_v63  ;;  %v891_v27 = vrot.slane %v2875_v2, %v2607_v0 }
 0x26a   : > { %v2897_v57 = vpop.permute.xlu0 %1115  ;;  %v722_v37 = vpop.permute.xlu1 %721  ;;  %v2063_v7 = vpack.c.bf16 %v1160_v30, %v1095_v17  ;;  %v1191_v51 = vsel %vm1184_vm8, %v2524_v15, %v2661_v53  ;;  %v1226_v59 = vmul.f32 %v1200_v41, %v1190_v16  ;;  %v895_v43 = vrot.slane %v2880_v38, %v2607_v0 }
 0x26b   : > { %v731_v28 = vsel %vm729_vm1, %v722_v37, %v2746_v62  ;;  %v732_v24 = vsel %vm729_vm1, %v2727_v19, %v722_v37  ;;  %v907_v19 = vmul.f32 %v899_v35, %v860_v50  ;;  %v972_v26 = vmul.f32 %v964_v47, %v925_v23  ;;  %v3175_v23 = vld [vmem:[#allocation10_spill] sm:$0xff] }
 0x26c   : > { %2060 = vmatpush1.bf16.msra.mxu0 %v2059_v11  ;;  %v775_v1 = vmul.f32 %v761_v25, %v732_v24  ;;  %v776_v54 = vmul.f32 %v765_v55, %v731_v28  ;;  %v1225_v3 = vmul.f32 %v1196_v46, %v1191_v51  ;;  %v1029_v35 = vrot.slane %v2784_v61, %v2644_v32 }
 0x26d   : > { %2062 = vmatprep.subr.bf16.mxu0 %v2061_v18  ;;  %v2101_v46 = vpack.c.bf16 %v972_v26, %v907_v19  ;;  %v1017_v37 = vrot.slane %v2684_v14, %v2644_v32  ;;  %v3174_v18 = vld [vmem:[#allocation13_spill] sm:$0xff]  ;;  %v1082_v50 = vrot.slane %v2684_v14, %v2671_v6  ;;  %v1086_v24 = vrot.slane %v2875_v2, %v2671_v6 }
 0x26e   : > { %v789_v52 = vpop.permute.xlu0 %788  ;;  %v919_v62 = vpop.permute.xlu1 %918 }
 0x26f   : > { %v796_v63 = vsel %vm794_vm2, %v789_v52, %v2725_v13  ;;  %v797_v44 = vsel %vm794_vm2, %v2696_v33, %v789_v52  ;;  %v926_v29 = vsel %vm924_vm3, %v919_v62, %v2792_v45  ;;  %v927_v0 = vsel %vm924_vm3, %v2762_v31, %v919_v62 }
 0x270   : > { %v840_v12 = vmul.f32 %v826_v9, %v797_v44  ;;  %v841_v53 = vmul.f32 %v830_v49, %v796_v63  ;;  %2064 = vmatpush1.bf16.msra.mxu0 %v2063_v7  ;;  %v1021_v13 = vrot.slane %v2875_v2, %v2644_v32  ;;  %v1025_v33 = vrot.slane %v2880_v38, %v2644_v32  ;;  %v3176_v32 = vld [vmem:[#allocation11_spill] sm:$0xff] }
 0x271   : > { %1254 = vmatprep.subr.mxu0 %v1226_v59  ;;  %v970_v11 = vmul.f32 %v956_v40, %v927_v0  ;;  %v971_v30 = vmul.f32 %v960_v39, %v926_v29  ;;  %v3177_v40 = vpack.c.bf16 %v3175_v23, %v3176_v32  ;;  %v1151_v7 = vrot.slane %v2875_v2, %v2666_v56  ;;  %v3180_v63 = vld [vmem:[#allocation7_spill] sm:$0xff]  ;;  %v3183_v29 = vld [vmem:[#allocation14_spill] sm:$0xff] }
 0x272   : > { %v2099_v8 = vpack.c.bf16 %v841_v53, %v776_v54  ;;  %v854_v41 = vpop.permute.xlu0 %853  ;;  %v984_v58 = vpop.permute.xlu1 %983  ;;  %v2081_v48 = vpack.c.bf16 %v840_v12, %v775_v1  ;;  %v3178_v52 = vmov 0.0   ;;  %v3181_v1 = vld [vmem:[#allocation6_spill] sm:$0xff]  ;;  %v1094_v12 = vrot.slane %v2784_v61, %v2671_v6  ;;  %v3182_v53 = vld [vmem:[#allocation15_spill] sm:$0xff] }
 0x273   : > { %v861_v45 = vsel %vm859_vm4, %v854_v41, %v2790_v42  ;;  %v862_v31 = vsel %vm859_vm4, %v2760_v4, %v854_v41  ;;  %v991_v47 = vsel %vm989_vm5, %v984_v58, %v2864_v22  ;;  %v992_v42 = vsel %vm989_vm5, %v2698_v34, %v984_v58  ;;  %v3186_v41 = vld [vmem:[#allocation8_spill] sm:$0xff] }
 0x274   : > { %v905_v25 = vmul.f32 %v891_v27, %v862_v31  ;;  %v906_v55 = vmul.f32 %v895_v43, %v861_v45  ;;  %1255 = vmatpush1.msra.mxu0 %v1225_v3  ;;  %2100 = vmatpush1.bf16.msra.mxu1 %v2099_v8  ;;  %v1035_v16 = vmul.f32 %v1021_v13, %v991_v47  ;;  %v3187_v45 = vld [vmem:[#allocation4_spill] sm:$0xff] }
 0x275   : > { %2082 = vmatprep.subr.bf16.mxu0 %v2081_v48  ;;  %2102 = vmatprep.subr.bf16.mxu1 %v2101_v46  ;;  %v1034_v51 = vmul.f32 %v1017_v37, %v992_v42  ;;  %v1090_v43 = vrot.slane %v2880_v38, %v2671_v6  ;;  %v3184_v0 = vpack.c.bf16 %v3182_v53, %v3183_v29 }
 0x276   : > { %v2103_v4 = vpack.c.bf16 %v971_v30, %v906_v55  ;;  %2014 = vmatmul.mubr.msk.f32.vlgmr.msra.gmra.mrb[4].mxu0 %vm1234_vm9, %v3174_v18  ;;  %v1049_v9 = vpop.permute.xlu0 %1048  ;;  %v988_v49 = vpop.permute.xlu1 %987  ;;  %v2085_v17 = vpack.c.bf16 %v970_v11, %v905_v25  ;;  %v2089_v44 = vpack.c.bf16 %v1035_v16, %v3180_v63  ;;  %v1155_v8 = vrot.slane %v2880_v38, %v2666_v56 }
 0x277   : > { %2084 = vmatpush1.bf16.msra.mxu0 %v3177_v40  ;;  %v990_v34 = vsel %vm989_vm5, %v2864_v22, %v988_v49  ;;  %v997_v28 = vsel %vm989_vm5, %v988_v49, %v2599_v60  ;;  %v1056_v59 = vsel %vm1054_vm7, %v1049_v9, %v2862_v20  ;;  %v1147_v22 = vrot.slane %v2684_v14, %v2666_v56  ;;  %v3179_v60 = vld [vmem:[#allocation5_spill] sm:$0xff] }
 0x278   : > { %v1036_v39 = vmul.f32 %v1025_v33, %v990_v34  ;;  %v1037_v27 = vmul.f32 %v1029_v35, %v997_v28  ;;  %2086 = vmatprep.subr.bf16.mxu0 %v2085_v17  ;;  %2104 = vmatpush1.bf16.msra.mxu1 %v2103_v4  ;;  %v3185_v33 = vld [vmem:[#allocation9_spill] sm:$0xff]  ;;  %v1057_v58 = vsel %vm1054_vm7, %v3186_v41, %v1049_v9 }
 0x279   : > { %1444 = vmatprep.mubr.f32.mxu0 %v3178_v52  ;;  %v1100_v6 = vmul.f32 %v1086_v24, %v1056_v59  ;;  %v1159_v35 = vrot.slane %v2784_v61, %v2666_v56  ;;  %v2091_v31 = vpack.c.bf16 %v1034_v51, %v3187_v45  ;;  %v1224_v37 = vrot.slane %v2784_v61, %v2723_v5 }
 0x27a   : > { %v2107_v62 = vpack.c.bf16 %v1036_v39, %v3179_v60  ;;  %v1053_v19 = vpop.permute.xlu0 %1052  ;;  %v1114_v26 = vpop.permute.xlu1 %1113  ;;  %v2105_v54 = vpack.c.bf16 %v1037_v27, %v3181_v1  ;;  %v1099_v56 = vmul.f32 %v1082_v50, %v1057_v58  ;;  %v1212_v61 = vrot.slane %v2684_v14, %v2723_v5  ;;  %v3188_v50 = vld [vmem:[#allocation12_spill] sm:$0xff] }
 0x27b   : > { %2088 = vmatpush1.bf16.msra.mxu0 %v3184_v0  ;;  %v1121_v13 = vsel %vm1119_vm6, %v1114_v26, %v2897_v57  ;;  %v1122_v3 = vsel %vm1119_vm6, %v3185_v33, %v1114_v26  ;;  %v1055_v47 = vsel %vm1054_vm7, %v2862_v20, %v1053_v19  ;;  %v1062_v46 = vsel %vm1054_vm7, %v1053_v19, %v2518_v10  ;;  %v1554_v19 = vld [vmem:[%s3143_s5] sm:$0xff] }
 0x27c   : > { %v1165_v48 = vmul.f32 %v1151_v7, %v1121_v13  ;;  %2090 = vmatprep.subr.bf16.mxu0 %v2089_v44  ;;  %v1164_v11 = vmul.f32 %v1147_v22, %v1122_v3  ;;  %2106 = vmatprep.subr.bf16.mxu1 %v2105_v54  ;;  %v1216_v10 = vrot.slane %v2875_v2, %v2723_v5 }
 0x27d   : > { %2108 = vmatpush1.bf16.msra.mxu1 %v2107_v62  ;;  %v1101_v4 = vmul.f32 %v1090_v43, %v1055_v47  ;;  %v1102_v16 = vmul.f32 %v1094_v12, %v1062_v46  ;;  %v1220_v34 = vrot.slane %v2880_v38, %v2723_v5 }
 0x27e   : > { %v1179_v30 = vpop.permute.xlu0 %1178  ;;  %v1118_v25 = vpop.permute.xlu1 %1117  ;;  %v2093_v55 = vpack.c.bf16 %v1165_v48, %v1100_v6  ;;  %v2095_v17 = vpack.c.bf16 %v1164_v11, %v1099_v56 }
 0x27f   : > { %2092 = vmatpush1.bf16.msra.mxu0 %v2091_v31  ;;  %v1120_v42 = vsel %vm1119_vm6, %v2897_v57, %v1118_v25  ;;  %v1127_v20 = vsel %vm1119_vm6, %v1118_v25, %v2639_v36  ;;  %v1187_v57 = vsel %vm1184_vm8, %v3188_v50, %v1179_v30 }
 0x280   : > { %v1166_v9 = vmul.f32 %v1155_v8, %v1120_v42  ;;  %v1167_v49 = vmul.f32 %v1159_v35, %v1127_v20  ;;  %2094 = vmatprep.subr.bf16.mxu0 %v2093_v55  ;;  %v1229_v27 = vmul.f32 %v1212_v61, %v1187_v57  ;;  %v2158_v55 = vld [vmem:[%s2326_s19 + $0x10] sm:$0xff]  ;;  %v2159_v42 = vld [vmem:[%s2326_s19 + $0x18] sm:$0xff]  ;;  %v2162_v61 = vld [vmem:[%s2326_s19] sm:$0xff] }
 0x282   : > { %v2111_v23 = vpack.c.bf16 %v1166_v9, %v1101_v4  ;;  %v1183_v32 = vpop.permute.xlu0 %1182  ;;  %v1181_v40 = vpop.permute.xlu1 %1180  ;;  %v2109_v36 = vpack.c.bf16 %v1167_v49, %v1102_v16  ;;  %v2161_v9 = vld [vmem:[%s2326_s19 + $0x58] sm:$0xff] }
 0x283   : > { %v1192_v2 = vsel %vm1184_vm8, %v1183_v32, %v2524_v15  ;;  %2096 = vmatpush1.bf16.msra.mxu0 %v2095_v17  ;;  %v1186_v28 = vsel %vm1184_vm8, %v1179_v30, %v1181_v40  ;;  %v1185_v24 = vsel %vm1184_vm8, %v1181_v40, %v1183_v32 }
 0x284   : > { %v1232_v14 = vmul.f32 %v1224_v37, %v1192_v2  ;;  %v1230_v39 = vmul.f32 %v1216_v10, %v1186_v28  ;;  %2110 = vmatprep.subr.bf16.mxu1 %v2109_v36  ;;  %v1231_v7 = vmul.f32 %v1220_v34, %v1185_v24  ;;  %v2160_v10 = vld [vmem:[%s2326_s19 + $0x50] sm:$0xff]  ;;  %v2164_v36 = vld [vmem:[%s2326_s19 + $0x40] sm:$0xff]  ;;  %v2165_v28 = vld [vmem:[%s2326_s19 + $0x48] sm:$0xff] }
 0x285   : > { %2112 = vmatpush1.bf16.msra.mxu1 %v2111_v23  ;;  %v2163_v23 = vld [vmem:[%s2326_s19 + $0x8] sm:$0xff] }
 0x286   : > { %1396 = vmatprep.subr.mxu0 %v1230_v39  ;;  %1467 = vmatprep.subr.mxu1 %v1232_v14  ;;  %v2166_v39 = vld [vmem:[%s2326_s19 + $0x20] sm:$0xff] }
 0x287   : > { %1397 = vmatpush1.msra.mxu0 %v1229_v27 }
 0x288   : > { %2016 = vmatmul.mubr.msk.f32.vlgmr.msra.gmra.mrb[6].mxu0 %vm1234_vm9, %v3174_v18 }
 0x289   : > { %1468 = vmatpush1.msra.mxu1 %v1231_v7  ;;  %1627 = vmatprep.mubr.f32.mxu0 %v3178_v52 }
 0x28a   : > { %2017 = vmatmul.mubr.msk.f32.vlgmr.msra.gmra.mrb[6].mxu1 %vm1234_vm9, %v3174_v18  ;;  %v1555_v18 = vld [vmem:[%s3143_s5 + $0x8] sm:$0xff] }
 0x28b   : > { %1704 = vmatprep.mubr.f32.mxu1 %v3178_v52 }
 0x293   : > { %v1524_v15 = vpop.permute.xlu1 %1523  ;;  %v1536_v5 = vpop.permute.xlu0 %1535 }
 0x32d   : > { %v1375_v21 = vpop.f32.mrb[4].mxu1 }
 0x32e   : > { %v1377_v38 = vpop.f32.mrb[5].mxu1  ;;  %v1528_v51 = vmul.f32 %v1524_v15, %v1375_v21  ;;  %v2167_v21 = vld [vmem:[%s2326_s19 + $0x28] sm:$0xff] }
 0x32f   : > { %v1529_v59 = vmul.f32 %v1524_v15, %v1377_v38  ;;  %v2168_v38 = vld [vmem:[%s2326_s19 + $0x30] sm:$0xff] }
 0x330   : > { %v1540_v22 = vadd.f32 %v1536_v5, %v1528_v51 }
 0x331   : > { %v1541_v60 = vadd.f32 %v1536_v5, %v1529_v59 }
 0x332   : > { %v1548_v62 = vmax.f32 %v1540_v22, 0.0  ;;  %v2169_v22 = vld [vmem:[%s2326_s19 + $0x38] sm:$0xff] }
 0x333   : > { %v1549_v43 = vmax.f32 %v1541_v60, 0.0 }
 0x335   : > { %1640 = vmatprep.subr.mxu1 %v1549_v43  ;;  %v2170_v43 = vld [vmem:[%s2326_s19 + $0x60] sm:$0xff] }
 0x336   : > { %1641 = vmatpush1.msra.mxu1 %v1548_v62 }
 0x337   : > { %2020 = vmatmul.mubr.msk.f32.vlgmr.msra.gmra.mrb[8].mxu1 %vm1556_vm10, %v1554_v19 }
 0x338   : > { %1710 = vmatprep.mubr.f32.mxu1 %v3178_v52 }
 0x33b   : > { %2021 = vmatmul.mubr.msk.f32.gmra.mrb[10].mxu1 %vm1556_vm10, %v1555_v18 }
 0x33c   : > { %1858 = vmatprep.mubr.f32.mxu1 %v3178_v52 }
 0x349   : > { %v1304_v26 = vpop.f32.mrb[4].mxu0 }
 0x34a   : > { %v1306_v63 = vpop.f32.mrb[5].mxu0  ;;  %v1526_v44 = vmul.f32 %v1524_v15, %v1304_v26 }
 0x34b   : > { %v1527_v1 = vmul.f32 %v1524_v15, %v1306_v63  ;;  %v2171_v63 = vld [vmem:[%s2326_s19 + $0x68] sm:$0xff] }
 0x34c   : > { %v1538_v54 = vadd.f32 %v1536_v5, %v1526_v44 }
 0x34d   : > { %v1539_v12 = vadd.f32 %v1536_v5, %v1527_v1  ;;  %v2172_v1 = vld [vmem:[%s2326_s19 + $0x70] sm:$0xff] }
 0x34e   : > { %v1546_v53 = vmax.f32 %v1538_v54, 0.0 }
 0x34f   : > { %v1547_v29 = vmax.f32 %v1539_v12, 0.0 }
 0x351   : > { %1563 = vmatprep.subr.mxu0 %v1547_v29 }
 0x352   : > { %1564 = vmatpush1.msra.mxu0 %v1546_v53  ;;  %v2173_v53 = vld [vmem:[%s2326_s19 + $0x78] sm:$0xff] }
 0x353   : > { %2018 = vmatmul.mubr.msk.f32.vlgmr.msra.gmra.mrb[8].mxu0 %vm1556_vm10, %v1554_v19 }
 0x354   : > { %1633 = vmatprep.mubr.f32.mxu0 %v3178_v52 }
 0x357   : > { %2019 = vmatmul.mubr.msk.f32.gmra.mrb[10].mxu0 %vm1556_vm10, %v1555_v18 }
 0x358   : > { %1781 = vmatprep.mubr.f32.mxu0 %v3178_v52 }
 0x35b   : > { %v1446_v0 = vpop.f32.mrb[6].mxu0 }
 0x35c   : > { %v1530_v13 = vmul.f32 %v1524_v15, %v1446_v0  ;;  %v1448_v33 = vpop.f32.mrb[7].mxu0 }
 0x35d   : > { %v1531_v3 = vmul.f32 %v1524_v15, %v1448_v33  ;;  %v1517_v8 = vpop.f32.mrb[6].mxu1 }
 0x35e   : > { %v1542_v41 = vadd.f32 %v1536_v5, %v1530_v13  ;;  %v1532_v58 = vmul.f32 %v1524_v15, %v1517_v8  ;;  %v1519_v6 = vpop.f32.mrb[7].mxu1 }
 0x35f   : > { %v1543_v48 = vadd.f32 %v1536_v5, %v1531_v3  ;;  %v1533_v35 = vmul.f32 %v1524_v15, %v1519_v6 }
 0x360   : > { %v1544_v45 = vadd.f32 %v1536_v5, %v1532_v58  ;;  %v1550_v46 = vmax.f32 %v1542_v41, 0.0 }
 0x361   : > { %v1551_v31 = vmax.f32 %v1543_v48, 0.0  ;;  %v1545_v47 = vadd.f32 %v1536_v5, %v1533_v35 }
 0x362   : > { %v1552_v30 = vmax.f32 %v1544_v45, 0.0 }
 0x363   : > { %v1553_v11 = vmax.f32 %v1545_v47, 0.0  ;;  %1717 = vmatprep.subr.mxu0 %v1551_v31 }
 0x364   : > { %1718 = vmatpush1.msra.mxu0 %v1550_v46 }
 0x365   : > { %1794 = vmatprep.subr.mxu1 %v1553_v11  ;;  %2022 = vmatmul.mubr.msk.f32.vlgmr.msra.gmra.mrb[12].mxu0 %vm1556_vm10, %v1554_v19 }
 0x366   : > { %1795 = vmatpush1.msra.mxu1 %v1552_v30  ;;  %1787 = vmatprep.mubr.f32.mxu0 %v3178_v52 }
 0x367   : > { %2024 = vmatmul.mubr.msk.f32.vlgmr.msra.gmra.mrb[12].mxu1 %vm1556_vm10, %v1554_v19 }
 0x368   : > { %1864 = vmatprep.mubr.f32.mxu1 %v3178_v52 }
 0x369   : > { %2023 = vmatmul.mubr.msk.f32.gmra.mrb[14].mxu0 %vm1556_vm10, %v1555_v18 }
 0x36b   : > { %2025 = vmatmul.mubr.msk.f32.gmra.mrb[14].mxu1 %vm1556_vm10, %v1555_v18 }
 0x40a   : > { %v1706_v25 = vpop.f32.mrb[8].mxu1 }
 0x40b   : > { %v1707_v37 = vadd.f32 %v2158_v55, %v1706_v25  ;;  %v1708_v56 = vpop.f32.mrb[9].mxu1 }
 0x40c   : > { %v1709_v20 = vadd.f32 %v2159_v42, %v1708_v56 }
 0x40d   : > { %1873 = vst [vmem:[%s3073_s20 + $0x10] sm:$0xff] %v1707_v37 }
 0x40e   : > { %1874 = vst [vmem:[%s3073_s20 + $0x18] sm:$0xff] %v1709_v20  ;;  %v1712_v52 = vpop.f32.mrb[10].mxu1 }
 0x40f   : > { %v1713_v4 = vadd.f32 %v2160_v10, %v1712_v52  ;;  %v1714_v16 = vpop.f32.mrb[11].mxu1 }
 0x410   : > { %v1715_v49 = vadd.f32 %v2161_v9, %v1714_v16 }
 0x411   : > { %1881 = vst [vmem:[%s3073_s20 + $0x50] sm:$0xff] %v1713_v4 }
 0x412   : > { %1882 = vst [vmem:[%s3073_s20 + $0x58] sm:$0xff] %v1715_v49 }
 0x414   : > { %v1913_v33 = vld [vmem:[%s3073_s20 + $0x10] sm:$0xff] (%p2278_p5) }
 0x415   : > { %v1915_v3 = vld [vmem:[%s3073_s20 + $0x18] sm:$0xff] (%p2278_p5)  ;;  %1914 = vst [vmem:[%s1896_s29 + $0x10] sm:$0xff] (%p2278_p5), %v1913_v33 }
 0x416   : > { %1916 = vst [vmem:[%s1896_s29 + $0x18] sm:$0xff] (%p2278_p5), %v1915_v3 }
 0x418   : > { %v1929_v45 = vld [vmem:[%s3073_s20 + $0x50] sm:$0xff] (%p2278_p5) }
 0x419   : > { %v1931_v31 = vld [vmem:[%s3073_s20 + $0x58] sm:$0xff] (%p2278_p5)  ;;  %1930 = vst [vmem:[%s1896_s29 + $0x90] sm:$0xff] (%p2278_p5), %v1929_v45 }
 0x41a   : > { %1932 = vst [vmem:[%s1896_s29 + $0x98] sm:$0xff] (%p2278_p5), %v1931_v31 }
 0x426   : > { %v1629_v17 = vpop.f32.mrb[8].mxu0 }
 0x427   : > { %v1630_v50 = vadd.f32 %v2162_v61, %v1629_v17  ;;  %v1631_v57 = vpop.f32.mrb[9].mxu0 }
 0x428   : > { %v1632_v32 = vadd.f32 %v2163_v23, %v1631_v57 }
 0x429   : > { %1871 = vst [vmem:[%s3073_s20] sm:$0xff] %v1630_v50 }
 0x42a   : > { %1872 = vst [vmem:[%s3073_s20 + $0x8] sm:$0xff] %v1632_v32  ;;  %v1635_v40 = vpop.f32.mrb[10].mxu0 }
 0x42b   : > { %v1636_v2 = vadd.f32 %v2164_v36, %v1635_v40  ;;  %v1637_v34 = vpop.f32.mrb[11].mxu0 }
 0x42c   : > { %v1638_v14 = vadd.f32 %v2165_v28, %v1637_v34 }
 0x42d   : > { %1879 = vst [vmem:[%s3073_s20 + $0x40] sm:$0xff] %v1636_v2 }
 0x42e   : > { %1880 = vst [vmem:[%s3073_s20 + $0x48] sm:$0xff] %v1638_v14 }
 0x430   : > { %v1909_v0 = vld [vmem:[%s3073_s20] sm:$0xff] (%p2278_p5) }
 0x431   : > { %v1911_v13 = vld [vmem:[%s3073_s20 + $0x8] sm:$0xff] (%p2278_p5)  ;;  %1910 = vst [vmem:[%s1896_s29] sm:$0xff] (%p2278_p5), %v1909_v0 }
 0x432   : > { %1912 = vst [vmem:[%s1896_s29 + $0x8] sm:$0xff] (%p2278_p5), %v1911_v13 }
 0x434   : > { %v1925_v48 = vld [vmem:[%s3073_s20 + $0x40] sm:$0xff] (%p2278_p5) }
 0x435   : > { %1926 = vst [vmem:[%s1896_s29 + $0x80] sm:$0xff] (%p2278_p5), %v1925_v48  ;;  %v1927_v35 = vld [vmem:[%s3073_s20 + $0x48] sm:$0xff] (%p2278_p5) }
 0x436   : > { %1928 = vst [vmem:[%s1896_s29 + $0x88] sm:$0xff] (%p2278_p5), %v1927_v35 }
 0x438   : > { %v1783_v24 = vpop.f32.mrb[12].mxu0 }
 0x439   : > { %v1784_v27 = vadd.f32 %v2166_v39, %v1783_v24  ;;  %v1785_v7 = vpop.f32.mrb[13].mxu0 }
 0x43a   : > { %v1860_v15 = vpop.f32.mrb[12].mxu1  ;;  %v1786_v5 = vadd.f32 %v2167_v21, %v1785_v7 }
 0x43b   : > { %1875 = vst [vmem:[%s3073_s20 + $0x20] sm:$0xff] %v1784_v27  ;;  %v1861_v51 = vadd.f32 %v2168_v38, %v1860_v15  ;;  %v1862_v59 = vpop.f32.mrb[13].mxu1 }
 0x43c   : > { %1876 = vst [vmem:[%s3073_s20 + $0x28] sm:$0xff] %v1786_v5  ;;  %v1863_v60 = vadd.f32 %v2169_v22, %v1862_v59  ;;  %v1789_v62 = vpop.f32.mrb[14].mxu0  ;;  %1893 = sbr.rel (!%p2278_p5) target bundleno = 1099 (0x44b), region = 71 }
 0x43d   : > { %1877 = vst [vmem:[%s3073_s20 + $0x30] sm:$0xff] %v1861_v51  ;;  %v1790_v19 = vadd.f32 %v2170_v43, %v1789_v62  ;;  %v1791_v18 = vpop.f32.mrb[15].mxu0 }
 0x43e   : > { %1878 = vst [vmem:[%s3073_s20 + $0x38] sm:$0xff] %v1863_v60  ;;  %v1866_v26 = vpop.f32.mrb[14].mxu1  ;;  %v1792_v44 = vadd.f32 %v2171_v63, %v1791_v18 }
 0x43f   : > { %1883 = vst [vmem:[%s3073_s20 + $0x60] sm:$0xff] %v1790_v19  ;;  %v1867_v54 = vadd.f32 %v2172_v1, %v1866_v26  ;;  %v1868_v12 = vpop.f32.mrb[15].mxu1 }
 0x440   : > { %1884 = vst [vmem:[%s3073_s20 + $0x68] sm:$0xff] %v1792_v44  ;;  %v1869_v29 = vadd.f32 %v2173_v53, %v1868_v12 }
 0x441   : > { %1885 = vst [vmem:[%s3073_s20 + $0x70] sm:$0xff] %v1867_v54 }
 0x442   : > { %1886 = vst [vmem:[%s3073_s20 + $0x78] sm:$0xff] %v1869_v29  ;;  %v1917_v8 = vld [vmem:[%s3073_s20 + $0x20] sm:$0xff] (%p2278_p5) }
 0x443   : > { %v1919_v41 = vld [vmem:[%s3073_s20 + $0x28] sm:$0xff]  ;;  %1918 = vst [vmem:[%s1896_s29 + $0x20] sm:$0xff] %v1917_v8 }
 0x444   : > { %1920 = vst [vmem:[%s1896_s29 + $0x28] sm:$0xff] %v1919_v41  ;;  %v1921_v58 = vld [vmem:[%s3073_s20 + $0x30] sm:$0xff] }
 0x445   : > { %v1923_v6 = vld [vmem:[%s3073_s20 + $0x38] sm:$0xff]  ;;  %1922 = vst [vmem:[%s1896_s29 + $0x30] sm:$0xff] %v1921_v58 }
 0x446   : > { %1924 = vst [vmem:[%s1896_s29 + $0x38] sm:$0xff] %v1923_v6  ;;  %v1933_v47 = vld [vmem:[%s3073_s20 + $0x60] sm:$0xff] }
 0x447   : > { %v1935_v46 = vld [vmem:[%s3073_s20 + $0x68] sm:$0xff]  ;;  %1934 = vst [vmem:[%s1896_s29 + $0xa0] sm:$0xff] %v1933_v47 }
 0x448   : > { %v1937_v11 = vld [vmem:[%s3073_s20 + $0x70] sm:$0xff]  ;;  %1936 = vst [vmem:[%s1896_s29 + $0xa8] sm:$0xff] %v1935_v46 }
 0x449   : > { %1938 = vst [vmem:[%s1896_s29 + $0xb0] sm:$0xff] %v1937_v11  ;;  %v1939_v30 = vld [vmem:[%s3073_s20 + $0x78] sm:$0xff] }
 0x44a   : > { %1940 = vst [vmem:[%s1896_s29 + $0xb8] sm:$0xff] %v1939_v30 }
 0x44b PF: > { %p13_p10 = scmp.ge.s32.totalorder %s2265_s25, 4   ;;  %s3189_s21 = smov %s2192_s22 }
 0x44c   : > { %s3190_s22 = smov %s2276_s28  ;;  %s3191_s23 = smov %s2265_s25 }
 0x44d   :  { %15 = sbr.rel (!%p13_p10) target bundleno = 2 (0x2), region = 125 }

</bundles_post_ra>
